<compile_context>
chip_gen: v7x
topology: tpu7x:2x2x1
jax: 0.10.0
libtpu: 0.0.40
codegen_flags: <defaults>
</compile_context>

<pallas_src>
import jax
import jax.numpy as jnp
from jax.experimental import pallas as pl
from jax.experimental.pallas import tpu as pltpu


def _multi_siam_kernel(x_ref, w_ref, bcls_ref, out_ref):
    # x_ref   : (T, B, C, HW)   f32, HW lane-dense
    # w_ref   : (dim+1, ncols)  f32 packed weights:
    #             rows [0:dim], cols [0:C]      = w_enc^T        (dim, C)
    #             rows [0:dim], col  [C]        = b_enc          (dim,)
    #             row  [dim],   cols [0:T*dim]  = w_cls          (PyTorch (1, T*dim) row)
    # bcls_ref: (1,) f32 in SMEM
    # out_ref : (B, Wout) f32, Wout = round_up(T*dim + 1, 128)
    T, B, C, HW = x_ref.shape
    dim = w_ref.shape[0] - 1
    Wout = out_ref.shape[1]
    inv_hw = jnp.float32(1.0 / HW)

    # ---- hoisted, loop-invariant weight views (built once, not T*C times) --
    w_cols = [w_ref[0:dim, c:c + 1].reshape(1, 1, dim, 1) for c in range(C)]
    b_col = w_ref[0:dim, C:C + 1].reshape(1, 1, dim, 1)

    x = x_ref[...]                                     # (T, B, C, HW)

    # 1x1 conv as C broadcast-FMAs on the VPU, batched over all T timesteps.
    h = x[:, :, 0:1, :] * w_cols[0]                    # (T, B, dim, HW)
    for c in range(1, C):
        h = h + x[:, :, c:c + 1, :] * w_cols[c]
    h = jnp.maximum(h + b_col, 0.0)                    # bias + ReLU
    emb = jnp.sum(h, axis=-1) * inv_hw                 # (T, B, dim)  GAP (lane reduce)

    # ---- single lane-dense output slab -------------------------------------
    out_ref[...] = jnp.zeros((B, Wout), jnp.float32)
    for t in range(T):
        out_ref[:, t * dim:(t + 1) * dim] = emb[t]     # concat layout

    # Classifier: ReLU(concat) @ w_cls^T + b_cls, as ONE lane-dense multiply
    # plus a single lane reduce over the (B, T*dim) concat.
    concat = jnp.maximum(out_ref[:, 0:T * dim], 0.0)   # literal ReLU kept for parity
    w_cls_row = w_ref[dim:dim + 1, 0:T * dim]          # (1, T*dim)
    logit = jnp.sum(concat * w_cls_row, axis=-1, keepdims=True) + bcls_ref[0]
    out_ref[:, T * dim:T * dim + 1] = logit


def multi_siam_concat(sample, params, T):
    """JAX/Pallas equivalent of MultiSiamConcat.forward.

    sample: dict with 't1'..'t5' images of shape (B, C, H, W) (NCHW).
    params: 'w_enc' (C, dim), 'b_enc' (dim,),
            'w_cls' (1, T*dim) [PyTorch Linear weight], 'b_cls' (1,).
    Returns (embedding_dict, logits) with logits of shape (B, 1).
    """
    all_timesteps = ['t1', 't2', 't3', 't4', 't5']
    timesteps = all_timesteps[-T:]

    imgs = [sample[k] for k in timesteps]
    B, C, H, W = imgs[0].shape
    HW = H * W

    # One stacked lane-dense input slab (T, B, C, HW): free per-image reshape,
    # HW stays on lanes, single input DMA instead of T.
    x_all = jnp.stack([img.reshape(B, C, HW).astype(jnp.float32) for img in imgs],
                      axis=0)

    dim = params['w_enc'].shape[1]
    assert params['w_enc'].shape[0] == C
    # Classifier weight columns must be ordered [emb of timesteps[-T:][0] | ...].
    assert params['w_cls'].shape == (1, T * dim)

    # Pack all VMEM-resident weights into one small array (single DMA).
    ncols = max(T * dim, C + 1)
    w_pack = jnp.zeros((dim + 1, ncols), jnp.float32)
    w_pack = w_pack.at[0:dim, 0:C].set(params['w_enc'].astype(jnp.float32).T)
    w_pack = w_pack.at[0:dim, C].set(params['b_enc'].astype(jnp.float32))
    w_pack = w_pack.at[dim, 0:T * dim].set(params['w_cls'].astype(jnp.float32).reshape(-1))
    b_cls = params['b_cls'].astype(jnp.float32).reshape((1,))

    n_valid = T * dim + 1
    w_out = ((n_valid + 127) // 128) * 128             # lane-dense output width

    flops = (2 * T * B * HW * C * dim                  # 1x1 conv
             + 2 * T * B * dim * HW                    # bias/ReLU + GAP
             + 2 * B * T * dim)                        # classifier
    bytes_accessed = 4 * (T * B * C * HW + (dim + 1) * ncols + 1 + B * w_out)

    vmem = pl.BlockSpec(memory_space=pltpu.MemorySpace.VMEM)
    smem = pl.BlockSpec(memory_space=pltpu.MemorySpace.SMEM)

    out = pl.pallas_call(
        _multi_siam_kernel,
        out_shape=jax.ShapeDtypeStruct((B, w_out), jnp.float32),
        in_specs=[vmem, vmem, smem],
        out_specs=vmem,
        cost_estimate=pl.CostEstimate(flops=flops, transcendentals=0,
                                      bytes_accessed=bytes_accessed),
    )(x_all, w_pack, b_cls)

    embedding_dict = {k: out[:, i * dim:(i + 1) * dim] for i, k in enumerate(timesteps)}
    logits = out[:, T * dim:T * dim + 1]
    return embedding_dict, logits


def _reference(sample, params, T):
    """Pure-JAX reference mirroring the PyTorch forward."""
    all_timesteps = ['t1', 't2', 't3', 't4', 't5']
    timesteps = all_timesteps[-T:]
    embs = []
    for k in timesteps:
        img = sample[k].astype(jnp.float32)                 # (B, C, H, W)
        B, C, H, W = img.shape
        x = img.reshape(B, C, H * W).transpose(0, 2, 1)     # (B, HW, C)
        h = jnp.maximum(x @ params['w_enc'] + params['b_enc'][None, None, :], 0.0)
        embs.append(jnp.mean(h, axis=1))                    # (B, dim)
    concat = jnp.concatenate([e.reshape(e.shape[0], -1) for e in embs], axis=1)
    concat = jnp.maximum(concat, 0.0)
    logits = concat @ params['w_cls'].T + params['b_cls'][None, :]
    return dict(zip(timesteps, embs)), logits


if __name__ == "__main__":
    B, C, H, W = 2, 4, 16, 16
    dim = 32
    T = 5  # config['timesteps']

    key = jax.random.PRNGKey(0)
    kw, kb, kcw, kcb, kx = jax.random.split(key, 5)

    params = {
        'w_enc': jax.random.normal(kw, (C, dim), jnp.float32) * 0.1,
        'b_enc': jax.random.normal(kb, (dim,), jnp.float32) * 0.1,
        'w_cls': jax.random.normal(kcw, (1, T * dim), jnp.float32) * 0.1,
        'b_cls': jax.random.normal(kcb, (1,), jnp.float32) * 0.1,
    }

    img_keys = jax.random.split(kx, 8)
    sample = {
        'base': jax.random.normal(img_keys[0], (B, C, H, W), jnp.float32),
        't1': jax.random.normal(img_keys[1], (B, C, H, W), jnp.float32),
        't2': jax.random.normal(img_keys[2], (B, C, H, W), jnp.float32),
        't3': jax.random.normal(img_keys[3], (B, C, H, W), jnp.float32),
        't4': jax.random.normal(img_keys[4], (B, C, H, W), jnp.float32),
        't5': jax.random.normal(img_keys[5], (B, C, H, W), jnp.float32),
        'change': jax.random.normal(img_keys[6], (B,), jnp.float32),
        'mask': jax.random.normal(img_keys[7], (B, H, W), jnp.float32),
    }

    emb_dict, logits = multi_siam_concat(sample, params, T)
    jax.block_until_ready(logits)

    ref_emb, ref_logits = _reference(sample, params, T)
    assert logits.shape == (B, 1)
    assert jnp.allclose(logits, ref_logits, atol=1e-4, rtol=1e-4)
    for k in ref_emb:
        assert emb_dict[k].shape == (B, dim)
        assert jnp.allclose(emb_dict[k], ref_emb[k], atol=1e-4, rtol=1e-4)

    print("KERNEL_OK")
</pallas_src>

<mosaic_0001>
module attributes {stable_mosaic.version = 11 : i64} {
  func.func @_multi_siam_kernel(%arg0: memref<5x2x4x256xf32, #tpu.memory_space<vmem>>, %arg1: memref<33x160xf32, #tpu.memory_space<vmem>>, %arg2: memref<1xf32, #tpu.memory_space<smem>>, %arg3: memref<2x256xf32, #tpu.memory_space<vmem>>) attributes {dimension_semantics = [], scalar_prefetch = 0 : i64, scratch_operands = 0 : i64, tpu.core_type = #tpu.core_type<tc>} {
    %c0 = arith.constant 0 : index
    %c0_0 = arith.constant 0 : index
    %0 = vector.load %arg1[%c0, %c0_0] : memref<33x160xf32, #tpu.memory_space<vmem>>, vector<32x1xf32>
    %1 = vector.shape_cast %0 : vector<32x1xf32> to vector<1x1x32x1xf32>
    %c0_1 = arith.constant 0 : index
    %c1 = arith.constant 1 : index
    %2 = vector.load %arg1[%c0_1, %c1] : memref<33x160xf32, #tpu.memory_space<vmem>>, vector<32x1xf32>
    %3 = vector.shape_cast %2 : vector<32x1xf32> to vector<1x1x32x1xf32>
    %c0_2 = arith.constant 0 : index
    %c2 = arith.constant 2 : index
    %4 = vector.load %arg1[%c0_2, %c2] : memref<33x160xf32, #tpu.memory_space<vmem>>, vector<32x1xf32>
    %5 = vector.shape_cast %4 : vector<32x1xf32> to vector<1x1x32x1xf32>
    %c0_3 = arith.constant 0 : index
    %c3 = arith.constant 3 : index
    %6 = vector.load %arg1[%c0_3, %c3] : memref<33x160xf32, #tpu.memory_space<vmem>>, vector<32x1xf32>
    %7 = vector.shape_cast %6 : vector<32x1xf32> to vector<1x1x32x1xf32>
    %c0_4 = arith.constant 0 : index
    %c4 = arith.constant 4 : index
    %8 = vector.load %arg1[%c0_4, %c4] : memref<33x160xf32, #tpu.memory_space<vmem>>, vector<32x1xf32>
    %9 = vector.shape_cast %8 : vector<32x1xf32> to vector<1x1x32x1xf32>
    %c0_5 = arith.constant 0 : index
    %c0_6 = arith.constant 0 : index
    %c0_7 = arith.constant 0 : index
    %c0_8 = arith.constant 0 : index
    %10 = vector.load %arg0[%c0_5, %c0_6, %c0_7, %c0_8] : memref<5x2x4x256xf32, #tpu.memory_space<vmem>>, vector<5x2x4x256xf32>
    %11 = vector.extract_strided_slice %10 {offsets = [0, 0, 0, 0], sizes = [5, 2, 1, 256], strides = [1, 1, 1, 1]} : vector<5x2x4x256xf32> to vector<5x2x1x256xf32>
    %12 = vector.broadcast %11 : vector<5x2x1x256xf32> to vector<5x2x32x256xf32>
    %13 = vector.broadcast %1 : vector<1x1x32x1xf32> to vector<5x2x32x256xf32>
    %14 = arith.mulf %12, %13 : vector<5x2x32x256xf32>
    %15 = vector.extract_strided_slice %10 {offsets = [0, 0, 1, 0], sizes = [5, 2, 1, 256], strides = [1, 1, 1, 1]} : vector<5x2x4x256xf32> to vector<5x2x1x256xf32>
    %16 = vector.broadcast %15 : vector<5x2x1x256xf32> to vector<5x2x32x256xf32>
    %17 = vector.broadcast %3 : vector<1x1x32x1xf32> to vector<5x2x32x256xf32>
    %18 = arith.mulf %16, %17 : vector<5x2x32x256xf32>
    %19 = arith.addf %14, %18 : vector<5x2x32x256xf32>
    %20 = vector.extract_strided_slice %10 {offsets = [0, 0, 2, 0], sizes = [5, 2, 1, 256], strides = [1, 1, 1, 1]} : vector<5x2x4x256xf32> to vector<5x2x1x256xf32>
    %21 = vector.broadcast %20 : vector<5x2x1x256xf32> to vector<5x2x32x256xf32>
    %22 = vector.broadcast %5 : vector<1x1x32x1xf32> to vector<5x2x32x256xf32>
    %23 = arith.mulf %21, %22 : vector<5x2x32x256xf32>
    %24 = arith.addf %19, %23 : vector<5x2x32x256xf32>
    %25 = vector.extract_strided_slice %10 {offsets = [0, 0, 3, 0], sizes = [5, 2, 1, 256], strides = [1, 1, 1, 1]} : vector<5x2x4x256xf32> to vector<5x2x1x256xf32>
    %26 = vector.broadcast %25 : vector<5x2x1x256xf32> to vector<5x2x32x256xf32>
    %27 = vector.broadcast %7 : vector<1x1x32x1xf32> to vector<5x2x32x256xf32>
    %28 = arith.mulf %26, %27 : vector<5x2x32x256xf32>
    %29 = arith.addf %24, %28 : vector<5x2x32x256xf32>
    %30 = vector.broadcast %9 : vector<1x1x32x1xf32> to vector<5x2x32x256xf32>
    %31 = arith.addf %29, %30 : vector<5x2x32x256xf32>
    %cst = arith.constant 0.000000e+00 : f32
    %32 = vector.broadcast %cst : f32 to vector<5x2x32x256xf32>
    %33 = arith.maximumf %31, %32 : vector<5x2x32x256xf32>
    %cst_9 = arith.constant dense<0.000000e+00> : vector<5x2x32xf32>
    %34 = vector.multi_reduction <add>, %33, %cst_9 [3] : vector<5x2x32x256xf32> to vector<5x2x32xf32>
    %cst_10 = arith.constant 3.906250e-03 : f32
    %35 = vector.broadcast %cst_10 : f32 to vector<5x2x32xf32>
    %36 = arith.mulf %34, %35 : vector<5x2x32xf32>
    %cst_11 = arith.constant 0.000000e+00 : f32
    %37 = vector.broadcast %cst_11 : f32 to vector<2x256xf32>
    %c0_12 = arith.constant 0 : index
    %c0_13 = arith.constant 0 : index
    %38 = vector.load %arg3[%c0_12, %c0_13] : memref<2x256xf32, #tpu.memory_space<vmem>>, vector<2x256xf32>
    tpu.vector_store %arg3[%c0_12, %c0_13], %37 {strides = array<i32>} : memref<2x256xf32, #tpu.memory_space<vmem>>, vector<2x256xf32>,
    %39 = vector.extract_strided_slice %36 {offsets = [0, 0, 0], sizes = [1, 2, 32], strides = [1, 1, 1]} : vector<5x2x32xf32> to vector<1x2x32xf32>
    %40 = vector.shape_cast %39 : vector<1x2x32xf32> to vector<2x32xf32>
    %c0_14 = arith.constant 0 : index
    %c0_15 = arith.constant 0 : index
    %41 = vector.load %arg3[%c0_14, %c0_15] : memref<2x256xf32, #tpu.memory_space<vmem>>, vector<2x32xf32>
    tpu.vector_store %arg3[%c0_14, %c0_15], %40 {strides = array<i32>} : memref<2x256xf32, #tpu.memory_space<vmem>>, vector<2x32xf32>,
    %42 = vector.extract_strided_slice %36 {offsets = [1, 0, 0], sizes = [1, 2, 32], strides = [1, 1, 1]} : vector<5x2x32xf32> to vector<1x2x32xf32>
    %43 = vector.shape_cast %42 : vector<1x2x32xf32> to vector<2x32xf32>
    %c0_16 = arith.constant 0 : index
    %c32 = arith.constant 32 : index
    %44 = vector.load %arg3[%c0_16, %c32] : memref<2x256xf32, #tpu.memory_space<vmem>>, vector<2x32xf32>
    tpu.vector_store %arg3[%c0_16, %c32], %43 {strides = array<i32>} : memref<2x256xf32, #tpu.memory_space<vmem>>, vector<2x32xf32>,
    %45 = vector.extract_strided_slice %36 {offsets = [2, 0, 0], sizes = [1, 2, 32], strides = [1, 1, 1]} : vector<5x2x32xf32> to vector<1x2x32xf32>
    %46 = vector.shape_cast %45 : vector<1x2x32xf32> to vector<2x32xf32>
    %c0_17 = arith.constant 0 : index
    %c64 = arith.constant 64 : index
    %47 = vector.load %arg3[%c0_17, %c64] : memref<2x256xf32, #tpu.memory_space<vmem>>, vector<2x32xf32>
    tpu.vector_store %arg3[%c0_17, %c64], %46 {strides = array<i32>} : memref<2x256xf32, #tpu.memory_space<vmem>>, vector<2x32xf32>,
    %48 = vector.extract_strided_slice %36 {offsets = [3, 0, 0], sizes = [1, 2, 32], strides = [1, 1, 1]} : vector<5x2x32xf32> to vector<1x2x32xf32>
    %49 = vector.shape_cast %48 : vector<1x2x32xf32> to vector<2x32xf32>
    %c0_18 = arith.constant 0 : index
    %c96 = arith.constant 96 : index
    %50 = vector.load %arg3[%c0_18, %c96] : memref<2x256xf32, #tpu.memory_space<vmem>>, vector<2x32xf32>
    tpu.vector_store %arg3[%c0_18, %c96], %49 {strides = array<i32>} : memref<2x256xf32, #tpu.memory_space<vmem>>, vector<2x32xf32>,
    %51 = vector.extract_strided_slice %36 {offsets = [4, 0, 0], sizes = [1, 2, 32], strides = [1, 1, 1]} : vector<5x2x32xf32> to vector<1x2x32xf32>
    %52 = vector.shape_cast %51 : vector<1x2x32xf32> to vector<2x32xf32>
    %c0_19 = arith.constant 0 : index
    %c128 = arith.constant 128 : index
    %53 = vector.load %arg3[%c0_19, %c128] : memref<2x256xf32, #tpu.memory_space<vmem>>, vector<2x32xf32>
    tpu.vector_store %arg3[%c0_19, %c128], %52 {strides = array<i32>} : memref<2x256xf32, #tpu.memory_space<vmem>>, vector<2x32xf32>,
    %c0_20 = arith.constant 0 : index
    %c0_21 = arith.constant 0 : index
    %54 = vector.load %arg3[%c0_20, %c0_21] : memref<2x256xf32, #tpu.memory_space<vmem>>, vector<2x160xf32>
    %cst_22 = arith.constant 0.000000e+00 : f32
    %55 = vector.broadcast %cst_22 : f32 to vector<2x160xf32>
    %56 = arith.maximumf %54, %55 : vector<2x160xf32>
    %c32_23 = arith.constant 32 : index
    %c0_24 = arith.constant 0 : index
    %57 = vector.load %arg1[%c32_23, %c0_24] : memref<33x160xf32, #tpu.memory_space<vmem>>, vector<1x160xf32>
    %58 = vector.broadcast %57 : vector<1x160xf32> to vector<2x160xf32>
    %59 = arith.mulf %56, %58 : vector<2x160xf32>
    %cst_25 = arith.constant dense<0.000000e+00> : vector<2xf32>
    %60 = vector.multi_reduction <add>, %59, %cst_25 [1] : vector<2x160xf32> to vector<2xf32>
    %61 = vector.shape_cast %60 : vector<2xf32> to vector<2x1xf32>
    %c0_26 = arith.constant 0 : index
    %62 = memref.load %arg2[%c0_26] : memref<1xf32, #tpu.memory_space<smem>>
    %63 = vector.broadcast %62 : f32 to vector<2x1xf32>
    %64 = arith.addf %61, %63 : vector<2x1xf32>
    %c0_27 = arith.constant 0 : index
    %c160 = arith.constant 160 : index
    %65 = vector.load %arg3[%c0_27, %c160] : memref<2x256xf32, #tpu.memory_space<vmem>>, vector<2x1xf32>
    tpu.vector_store %arg3[%c0_27, %c160], %64 {strides = array<i32>} : memref<2x256xf32, #tpu.memory_space<vmem>>, vector<2x1xf32>,
    return
  }
}

</mosaic_0001>

<bundles_post_ra>
// kernel: tpu_custom_call.1
= control target key start
LH: loop header
LB: loop body
LE: loop exit
PB: predicated region body
PF: predicated region fallthrough
CT: control target
= control target key end

     0   :  { %9 = vsyncpa [#allocation4], 0  ;;  %s5977_s0 = inlined_call_operand.hbm [shape: f32[5,2,4,256], index: 0, kind: input, shape index: {}]   ;;  %s5978_s1 = inlined_call_operand.hbm [shape: f32[33,160], index: 1, kind: input, shape index: {}]   ;;  %s5979_s2 = inlined_call_operand.<no memory space> [shape: f32[1], index: 2, kind: input, shape index: {}]   ;;  %s5980_s3 = inlined_call_operand.hbm [shape: f32[2,256], index: 3, kind: output, shape index: {}]  }
   0x1   :  { %10 = vsyncpa [#allocation7], 0 }
   0x2   :  { %11 = vsyncpa [#allocation5], 0  ;;  %s4150_s12 = smov [#allocation3]   ;;  %s4078_s16 = scalar_lea.hbm %s5977_s0, 1280 }
   0x3   :  { %s17_s13 = sshll.u32 %s4150_s12, 4  ;;  %p4079_p0 = scmp.ne.s32.totalorder %s5977_s0, %s4078_s16  ;;  %s18_s13 = int_to_ptr.vmem [resolvable:$true] %s17_s13 }
   0x4   :  { %p4082_p1 = scmp.lt.u32.totalorder %s4078_s16, %s5977_s0 }
   0x6   :  { %p4084_p2 = pnand %p4082_p1, %p4079_p0 }
   0x8   :  { %4087 = shalt.err (!%p4084_p2)
}
   0x9   :  { %s4088_s21 = scalar_lea.vmem %s18_s13, 1280  ;;  %p4093_p4 = scmp.lt.s32.totalorder %s18_s13, %s18_s13 }
   0xa   :  { %p4089_p3 = scmp.ne.s32.totalorder %s18_s13, %s4088_s21  ;;  %p4094_p5 = scmp.lt.s32.totalorder %s4088_s21, %s4088_s21 }
   0xc   :  { %p4095_p6 = por %p4094_p5, %p4093_p4 }
   0xe   :  { %p4096_p7 = pnand %p4095_p6, %p4089_p3 }
  0x10   :  { %4099 = shalt.err (!%p4096_p7)
}
  0x11   :  { %s4151_s22 = smov 128   ;;  %s4152_s23 = smov 8  }
  0x12   :  { %23 = dma.hbm_to_vmem [thread:$0]  %s5977_s0, 1280, %s18_s13, [#allocation4], %s4151_s22, %s4151_s22, %s4152_s23  }
  0x13   :  { %s4153_s26 = smov [#allocation6]   ;;  %s4100_s30 = scalar_lea.hbm %s5978_s1, 1280 }
  0x14   :  { %s29_s27 = sshll.u32 %s4153_s26, 4  ;;  %p4101_p8 = scmp.ne.s32.totalorder %s5978_s1, %s4100_s30  ;;  %s30_s27 = int_to_ptr.vmem [resolvable:$true] %s29_s27 }
  0x15   :  { %p4104_p9 = scmp.lt.u32.totalorder %s4100_s30, %s5978_s1 }
  0x17   :  { %p4106_p10 = pnand %p4104_p9, %p4101_p8 }
  0x19   :  { %4109 = shalt.err (!%p4106_p10)
}
  0x1a   :  { %s4110_s8 = scalar_lea.vmem %s30_s27, 1280  ;;  %p4115_p12 = scmp.lt.s32.totalorder %s30_s27, %s30_s27 }
  0x1b   :  { %p4111_p11 = scmp.ne.s32.totalorder %s30_s27, %s4110_s8  ;;  %p4116_p13 = scmp.lt.s32.totalorder %s4110_s8, %s4110_s8 }
  0x1d   :  { %p4117_p0 = por %p4116_p13, %p4115_p12 }
  0x1f   :  { %p4118_p1 = pnand %p4117_p0, %p4111_p11 }
  0x21   :  { %4121 = shalt.err (!%p4118_p1)
}
  0x22   :  { %s4154_s0 = smov 256   ;;  %s4155_s9 = smov 16  }
  0x23   :  { %35 = dma.hbm_to_vmem [thread:$0]  %s5978_s1, 1280, %s30_s27, [#allocation7], %s4154_s0, %s4154_s0, %s4155_s9  }
  0x24   :  { %4144 = dma.done.wait [#allocation4], 1280  }
  0x25   :  { %4145 = vsyncadd [#allocation4], 4294966016 }
  0x26   :  { %4146 = dma.done.wait [#allocation7], 1280  }
  0x27   :  { %4147 = vsyncadd [#allocation7], 4294966016  ;;  %v4156_v0 = vmov 1   ;;  %v4157_v1 = vmov 0   ;;  %v46_v2 = vld [vmem:[#allocation6 + $0x20] sm:$0xff]  ;;  %v47_v4 = vld [vmem:[#allocation6 + $0x30] sm:$0xff]  ;;  %v5981_v9 = vlaneseq }
  0x28   :  { %4067 = vset.pattern.permute.xlu0 %v4156_v0  ;;  %4066 = vset.pattern.permute.xlu1 %v4157_v1  ;;  %v44_v3 = vld [vmem:[#allocation6] sm:$0xff]  ;;  %v45_v5 = vld [vmem:[#allocation6 + $0x10] sm:$0xff]  ;;  %v4158_v6 = vmov 2   ;;  %v4159_v7 = vmov 3   ;;  %v4160_v8 = vmov 4   ;;  %v49_v16 = vld [vmem:[#allocation3 + $0x8] sm:$0xff] }
  0x29   :  { %260 = vperm.xlu1 %4066, %v46_v2   ;;  %529 = vperm.xlu0 %4067, %v44_v3   ;;  %v4213_v10 = vshrl.u32 %v5981_v9, 7  ;;  %v48_v13 = vld [vmem:[#allocation3] sm:$0xff]  ;;  %v4231_v21 = vld [vmem:[#allocation3 + $0x10] sm:$0xff]  ;;  %v51_v44 = vld [vmem:[#allocation3 + $0x18] sm:$0xff]  ;;  %vm2156_vm0 = vcmask 130112   ;;  %vm2163_vm1 = vcmask 195712  }
  0x2a   :  { %vm2170_vm2 = vcmask 261312   ;;  %vm2191_vm3 = vcmask 1041409   ;;  %vm2201_vm4 = vcmask 254976   ;;  %vm2605_vm5 = vcmask 392512   ;;  %s4167_s13 = smov [#allocation8]  }
  0x2b   :  { %6109 = vst [vmem:[#allocation12_spill] sm:$0xff] %v4213_v10  ;;  %v4216_v11 = vsub.s32 0, %v4213_v10  ;;  %v4219_v12 = vsub.s32 4, %v4213_v10  ;;  %v4222_v14 = vsub.s32 1, %v4213_v10  ;;  %v4225_v15 = vsub.s32 5, %v4213_v10  ;;  %s4038_s14 = sshll.u32 %s4167_s13, 4  ;;  %s4039_s14 = int_to_ptr.vmem [resolvable:$true] %s4038_s14 }
  0x2c   :  { %v4238_v26 = vsub.s32 2, %v4213_v10  ;;  %v4241_v27 = vsub.s32 6, %v4213_v10  ;;  %v4260_v34 = vsub.s32 3, %v4213_v10  ;;  %v4263_v35 = vsub.s32 7, %v4213_v10  ;;  %s4122_s15 = scalar_lea.vmem %s4039_s14, 64  ;;  %p4127_p3 = scmp.lt.s32.totalorder %s4039_s14, %s4039_s14 }
  0x2d   :  { %265 = vperm.xlu1 %4066, %v47_v4   ;;  %541 = vperm.xlu0 %4067, %v47_v4   ;;  %6110 = vst [vmem:[#allocation13_spill] sm:$0xff] %v4216_v11  ;;  %6111 = vst [vmem:[#allocation14_spill] sm:$0xff] %v4222_v14  ;;  %v71_v17 = vrot.slane %v48_v13, %v4216_v11  ;;  %v75_v18 = vrot.slane %v48_v13, %v4219_v12  ;;  %vm2612_vm6 = vcmask 458112   ;;  %vm2619_vm7 = vcmask 523712   ;;  %p4123_p2 = scmp.ne.s32.totalorder %s4039_s14, %s4122_s15  ;;  %p4128_p4 = scmp.lt.s32.totalorder %s4122_s15, %s4122_s15 }
  0x2e   :  { %v351_v19 = vrot.slane %v48_v13, %v4222_v14  ;;  %v355_v20 = vrot.slane %v48_v13, %v4225_v15  ;;  %v79_v22 = vrot.slane %v49_v16, %v4216_v11  ;;  %v83_v23 = vrot.slane %v49_v16, %v4219_v12  ;;  %6112 = vst [vmem:[#allocation15_spill] sm:$0xff] %v4238_v26 }
  0x2f   :  { %v359_v24 = vrot.slane %v49_v16, %v4222_v14  ;;  %v363_v25 = vrot.slane %v49_v16, %v4225_v15  ;;  %6113 = vst [vmem:[#allocation16_spill] sm:$0xff] %v4241_v27  ;;  %v4244_v28 = vrot.slane %v71_v17, %v4216_v11  ;;  %v4247_v29 = vrot.slane %v75_v18, %v4216_v11  ;;  %p4129_p5 = por %p4128_p4, %p4127_p3 }
  0x30   :  { %v87_v30 = vrot.slane %v4231_v21, %v4216_v11  ;;  %v91_v31 = vrot.slane %v4231_v21, %v4219_v12  ;;  %v4254_v32 = vrot.slane %v351_v19, %v4222_v14  ;;  %v4257_v33 = vrot.slane %v355_v20, %v4222_v14  ;;  %6114 = vst [vmem:[#allocation17_spill] sm:$0xff] %v4260_v34  ;;  %v53_v20 = vld [vmem:[#allocation3 + $0x28] sm:$0xff] }
  0x31   :  { %4068 = vset.pattern.permute.xlu1 %v4156_v0  ;;  %4070 = vset.pattern.permute.xlu0 %v4158_v6  ;;  %6115 = vst [vmem:[#allocation18_spill] sm:$0xff] %v4263_v35  ;;  %v4266_v36 = vrot.slane %v79_v22, %v4216_v11  ;;  %v4269_v37 = vrot.slane %v83_v23, %v4216_v11  ;;  %vm2649_vm8 = vcmask 517376   ;;  %vm3053_vm9 = vcmask 654912   ;;  %p4130_p6 = pnand %p4129_p5, %p4123_p2 }
  0x32   :  { %533 = vperm.xlu1 %4068, %v45_v5   ;;  %889 = vperm.xlu0 %4070, %v45_v5   ;;  %v4272_v38 = vrot.slane %v359_v24, %v4222_v14  ;;  %v4275_v39 = vrot.slane %v363_v25, %v4222_v14  ;;  %v707_v40 = vrot.slane %v48_v13, %v4238_v26  ;;  %vm3060_vm10 = vcmask 720512  }
  0x33   :  { %v711_v41 = vrot.slane %v48_v13, %v4241_v27  ;;  %v367_v42 = vrot.slane %v4231_v21, %v4222_v14  ;;  %v371_v43 = vrot.slane %v4231_v21, %v4225_v15  ;;  %v715_v45 = vrot.slane %v49_v16, %v4238_v26 }
  0x34   :  { %v719_v46 = vrot.slane %v49_v16, %v4241_v27  ;;  %v4286_v47 = vrot.slane %v87_v30, %v4216_v11  ;;  %v4289_v48 = vrot.slane %v91_v31, %v4216_v11  ;;  %v1063_v49 = vrot.slane %v48_v13, %v4260_v34 }
  0x35   :  { %v1067_v50 = vrot.slane %v48_v13, %v4263_v35  ;;  %v1071_v51 = vrot.slane %v49_v16, %v4260_v34  ;;  %v1075_v52 = vrot.slane %v49_v16, %v4263_v35  ;;  %v723_v53 = vrot.slane %v4231_v21, %v4238_v26  ;;  %v52_v13 = vld [vmem:[#allocation3 + $0x20] sm:$0xff] }
  0x36   :  { %537 = vperm.xlu1 %4068, %v46_v2   ;;  %4071 = vset.pattern.permute.xlu0 %v4159_v7  ;;  %v727_v54 = vrot.slane %v4231_v21, %v4241_v27  ;;  %v95_v55 = vrot.slane %v51_v44, %v4216_v11  ;;  %v99_v56 = vrot.slane %v51_v44, %v4219_v12  ;;  %vm3067_vm11 = vcmask 786112  }
  0x37   :  { %1241 = vperm.xlu0 %4071, %v44_v3   ;;  %v4302_v57 = vrot.slane %v707_v40, %v4238_v26  ;;  %v4305_v58 = vrot.slane %v711_v41, %v4238_v26  ;;  %v4308_v59 = vrot.slane %v367_v42, %v4222_v14  ;;  %v4311_v60 = vrot.slane %v371_v43, %v4222_v14 }
  0x38   :  { %v4314_v61 = vrot.slane %v715_v45, %v4238_v26  ;;  %v4317_v62 = vrot.slane %v719_v46, %v4238_v26  ;;  %v375_v63 = vrot.slane %v51_v44, %v4222_v14  ;;  %v379_v0 = vrot.slane %v51_v44, %v4225_v15 }
  0x39   :  { %v1079_v16 = vrot.slane %v4231_v21, %v4260_v34  ;;  %v1083_v17 = vrot.slane %v4231_v21, %v4263_v35  ;;  %v731_v18 = vrot.slane %v51_v44, %v4238_v26  ;;  %v735_v19 = vrot.slane %v51_v44, %v4241_v27 }
  0x3a   :  { %4069 = vset.pattern.permute.xlu1 %v4158_v6  ;;  %v4337_v6 = vrot.slane %v727_v54, %v4238_v26  ;;  %v4352_v22 = vrot.slane %v375_v63, %v4222_v14  ;;  %v4355_v23 = vrot.slane %v379_v0, %v4222_v14  ;;  %v1087_v24 = vrot.slane %v51_v44, %v4260_v34 }
  0x3b   :  { %885 = vperm.xlu1 %4069, %v44_v3   ;;  %1253 = vperm.xlu0 %4071, %v47_v4   ;;  %v1091_v25 = vrot.slane %v51_v44, %v4263_v35  ;;  %v103_v30 = vrot.slane %v52_v13, %v4216_v11  ;;  %v107_v31 = vrot.slane %v52_v13, %v4219_v12  ;;  %vm3097_vm12 = vcmask 779776  }
  0x3c   :  { %6120 = vst [vmem:[#allocation23_spill] sm:$0xff] %v4352_v22  ;;  %6121 = vst [vmem:[#allocation24_spill] sm:$0xff] %v4355_v23  ;;  %v383_v21 = vrot.slane %v52_v13, %v4222_v14  ;;  %v387_v40 = vrot.slane %v52_v13, %v4225_v15  ;;  %v111_v41 = vrot.slane %v53_v20, %v4216_v11  ;;  %vm3501_vm13 = vcmask 917312  }
  0x3d   :  { %v115_v42 = vrot.slane %v53_v20, %v4219_v12  ;;  %v391_v43 = vrot.slane %v53_v20, %v4222_v14  ;;  %v395_v45 = vrot.slane %v53_v20, %v4225_v15  ;;  %v4368_v46 = vrot.slane %v1079_v16, %v4260_v34 }
  0x3e   :  { %v4371_v44 = vrot.slane %v1083_v17, %v4260_v34  ;;  %v743_v54 = vrot.slane %v52_v13, %v4241_v27  ;;  %v4394_v63 = vrot.slane %v383_v21, %v4222_v14  ;;  %v4397_v0 = vrot.slane %v387_v40, %v4222_v14  ;;  %v55_v40 = vld [vmem:[#allocation3 + $0x38] sm:$0xff] }
  0x3f   :  { %893 = vperm.xlu1 %4069, %v46_v2   ;;  %4074 = vset.pattern.permute.xlu0 %v4160_v8  ;;  %6122 = vst [vmem:[#allocation25_spill] sm:$0xff] %v4368_v46  ;;  %v4400_v16 = vrot.slane %v111_v41, %v4216_v11  ;;  %v4403_v17 = vrot.slane %v115_v42, %v4216_v11  ;;  %v4415_v41 = vld [vmem:[#allocation3 + $0x40] sm:$0xff]  ;;  %vm3508_vm14 = vcmask 982912   ;;  %vm3515_vm15 = vcmask 1048512  }
  0x40   :  { %1421 = vperm.xlu0 %4074, %v45_v5   ;;  %6123 = vst [vmem:[#allocation26_spill] sm:$0xff] %v4371_v44  ;;  %6130 = vst [vmem:[#allocation33_spill] sm:$0xff] %v4394_v63  ;;  %v751_v21 = vrot.slane %v53_v20, %v4241_v27  ;;  %v1107_v9 = vrot.slane %v53_v20, %v4263_v35 }
  0x41   :  { %6131 = vst [vmem:[#allocation34_spill] sm:$0xff] %v4397_v0  ;;  %6132 = vst [vmem:[#allocation35_spill] sm:$0xff] %v4400_v16 }
  0x42   :  { %6133 = vst [vmem:[#allocation36_spill] sm:$0xff] %v4403_v17  ;;  %6136 = vst [vmem:[#allocation39_spill] sm:$0xff] %v4415_v41 }
  0x43   :  { %897 = vperm.xlu1 %4069, %v47_v4  }
  0x44   :  { %4075 = vset.pattern.permute.xlu0 %v4157_v1 }
  0x45   :  { %250 = vperm.xlu0 %4075, %v44_v3  }
  0x47   :  { %4072 = vset.pattern.permute.xlu1 %v4159_v7  ;;  %v4340_v7 = vrot.slane %v95_v55, %v4216_v11  ;;  %v4388_v55 = vrot.slane %v103_v30, %v4216_v11  ;;  %v1099_v30 = vrot.slane %v52_v13, %v4263_v35 }
  0x48   :  { %1245 = vperm.xlu1 %4072, %v45_v5  }
  0x49   :  { %255 = vperm.xlu0 %4075, %v45_v5   ;;  %v4334_v5 = vrot.slane %v723_v53, %v4238_v26  ;;  %6118 = vst [vmem:[#allocation21_spill] sm:$0xff] %v4340_v7  ;;  %v739_v53 = vrot.slane %v52_v13, %v4238_v26  ;;  %6128 = vst [vmem:[#allocation31_spill] sm:$0xff] %v4388_v55 }
  0x4b   :  { %v4418_v42 = vrot.slane %v739_v53, %v4238_v26  ;;  %v131_v53 = vrot.slane %v55_v40, %v4219_v12 }
  0x4c   :  { %1249 = vperm.xlu1 %4072, %v46_v2  }
  0x4d   :  { %6137 = vst [vmem:[#allocation40_spill] sm:$0xff] %v4418_v42  ;;  %v4439_v42 = vrot.slane %v1099_v30, %v4260_v34 }
  0x4f   :  { %6140 = vst [vmem:[#allocation43_spill] sm:$0xff] %v4439_v42 }
  0x50   :  { %4073 = vset.pattern.permute.xlu1 %v4160_v8  ;;  %v4343_v8 = vrot.slane %v99_v56, %v4216_v11  ;;  %v4391_v56 = vrot.slane %v107_v31, %v4216_v11  ;;  %v747_v31 = vrot.slane %v53_v20, %v4238_v26 }
  0x51   :  { %1417 = vperm.xlu1 %4073, %v44_v3   ;;  %v4328_v3 = vrot.slane %v1071_v51, %v4260_v34  ;;  %v4380_v51 = vrot.slane %v1087_v24, %v4260_v34  ;;  %v54_v24 = vld [vmem:[#allocation3 + $0x30] sm:$0xff] }
  0x52   :  { %6119 = vst [vmem:[#allocation22_spill] sm:$0xff] %v4343_v8  ;;  %6129 = vst [vmem:[#allocation32_spill] sm:$0xff] %v4391_v56  ;;  %v119_v10 = vrot.slane %v54_v24, %v4216_v11  ;;  %v399_v17 = vrot.slane %v54_v24, %v4222_v14  ;;  %v403_v16 = vrot.slane %v54_v24, %v4225_v15 }
  0x53   :  { %6116 = vst [vmem:[#allocation19_spill] sm:$0xff] %v4328_v3  ;;  %6126 = vst [vmem:[#allocation29_spill] sm:$0xff] %v4380_v51  ;;  %v127_v56 = vrot.slane %v55_v40, %v4216_v11  ;;  %v4442_v55 = vrot.slane %v747_v31, %v4238_v26  ;;  %v407_v51 = vrot.slane %v55_v40, %v4222_v14 }
  0x54   :  { %v4462_v31 = vrot.slane %v399_v17, %v4222_v14  ;;  %v759_v17 = vrot.slane %v54_v24, %v4241_v27 }
  0x55   :  { %1425 = vperm.xlu1 %4073, %v46_v2   ;;  %v4325_v2 = vrot.slane %v1067_v50, %v4260_v34  ;;  %v4377_v50 = vrot.slane %v735_v19, %v4238_v26  ;;  %v4409_v19 = vrot.slane %v395_v45, %v4222_v14  ;;  %v1103_v45 = vrot.slane %v53_v20, %v4260_v34 }
  0x56   :  { %6141 = vst [vmem:[#allocation44_spill] sm:$0xff] %v4442_v55  ;;  %6147 = vst [vmem:[#allocation50_spill] sm:$0xff] %v4462_v31  ;;  %v1119_v31 = vrot.slane %v55_v40, %v4260_v34 }
  0x57   :  { %6125 = vst [vmem:[#allocation28_spill] sm:$0xff] %v4377_v50  ;;  %6135 = vst [vmem:[#allocation38_spill] sm:$0xff] %v4409_v19  ;;  %v4445_v50 = vrot.slane %v751_v21, %v4238_v26  ;;  %v4465_v21 = vrot.slane %v403_v16, %v4222_v14  ;;  %v415_v16 = vrot.slane %v4415_v41, %v4222_v14 }
  0x59   :  { %1429 = vperm.xlu1 %4073, %v47_v4   ;;  %v4331_v4 = vrot.slane %v1075_v52, %v4260_v34  ;;  %v4383_v52 = vrot.slane %v1091_v25, %v4260_v34  ;;  %v1095_v25 = vrot.slane %v52_v13, %v4260_v34  ;;  %v123_v13 = vrot.slane %v54_v24, %v4219_v12 }
  0x5a   :  { %6142 = vst [vmem:[#allocation45_spill] sm:$0xff] %v4445_v50  ;;  %6148 = vst [vmem:[#allocation51_spill] sm:$0xff] %v4465_v21 }
  0x5b   :  { %6117 = vst [vmem:[#allocation20_spill] sm:$0xff] %v4331_v4  ;;  %6127 = vst [vmem:[#allocation30_spill] sm:$0xff] %v4383_v52  ;;  %v4436_v20 = vrot.slane %v1095_v25, %v4260_v34  ;;  %v4451_v52 = vrot.slane %v1107_v9, %v4260_v34  ;;  %v411_v25 = vrot.slane %v55_v40, %v4225_v15 }
  0x5c   :  { %v4459_v30 = vrot.slane %v123_v13, %v4216_v11  ;;  %v4471_v9 = vrot.slane %v131_v53, %v4216_v11  ;;  %v57_v13 = vld [vmem:[#allocation3 + $0x48] sm:$0xff]  ;;  %v1111_v53 = vrot.slane %v54_v24, %v4260_v34 }
  0x5d   :  { %4076 = vset.pattern.permute.xlu1 %v4157_v1  ;;  %v4322_v1 = vrot.slane %v1063_v49, %v4260_v34  ;;  %v4374_v49 = vrot.slane %v731_v18, %v4238_v26  ;;  %v4406_v18 = vrot.slane %v391_v43, %v4222_v14  ;;  %v4421_v43 = vrot.slane %v743_v54, %v4238_v26 }
  0x5e   :  { %v135_v54 = vrot.slane %v4415_v41, %v4216_v11  ;;  %6139 = vst [vmem:[#allocation42_spill] sm:$0xff] %v4436_v20  ;;  %6144 = vst [vmem:[#allocation47_spill] sm:$0xff] %v4451_v52  ;;  %v4456_v20 = vrot.slane %v119_v10, %v4216_v11  ;;  %v147_v21 = vrot.slane %v57_v13, %v4219_v12 }
  0x5f   :  { %6124 = vst [vmem:[#allocation27_spill] sm:$0xff] %v4374_v49  ;;  %6134 = vst [vmem:[#allocation37_spill] sm:$0xff] %v4406_v18  ;;  %v4448_v49 = vrot.slane %v1103_v45, %v4260_v34  ;;  %v4468_v45 = vrot.slane %v127_v56, %v4216_v11  ;;  %v419_v56 = vrot.slane %v4415_v41, %v4225_v15 }
  0x60   :  { %6138 = vst [vmem:[#allocation41_spill] sm:$0xff] %v4421_v43  ;;  %v139_v43 = vrot.slane %v4415_v41, %v4219_v12  ;;  %6145 = vst [vmem:[#allocation48_spill] sm:$0xff] %v4456_v20  ;;  %v4474_v52 = vrot.slane %v135_v54, %v4216_v11  ;;  %v4488_v54 = vrot.slane %v407_v51, %v4222_v14 }
  0x61   :  { %6143 = vst [vmem:[#allocation46_spill] sm:$0xff] %v4448_v49  ;;  %6146 = vst [vmem:[#allocation49_spill] sm:$0xff] %v4459_v30  ;;  %v755_v30 = vrot.slane %v54_v24, %v4238_v26  ;;  %v1123_v20 = vrot.slane %v55_v40, %v4263_v35  ;;  %v427_v51 = vrot.slane %v57_v13, %v4225_v15 }
  0x62   :  { %6149 = vst [vmem:[#allocation52_spill] sm:$0xff] %v4468_v45  ;;  %6150 = vst [vmem:[#allocation53_spill] sm:$0xff] %v4471_v9  ;;  %v4477_v10 = vrot.slane %v139_v43, %v4216_v11  ;;  %v1115_v9 = vrot.slane %v54_v24, %v4263_v35  ;;  %v4491_v43 = vrot.slane %v411_v25, %v4222_v14 }
  0x63   :  { %6151 = vst [vmem:[#allocation54_spill] sm:$0xff] %v4474_v52  ;;  %6153 = vst [vmem:[#allocation56_spill] sm:$0xff] %v4488_v54  ;;  %v767_v52 = vrot.slane %v55_v40, %v4241_v27  ;;  %v143_v45 = vrot.slane %v57_v13, %v4216_v11  ;;  %v423_v24 = vrot.slane %v57_v13, %v4222_v14 }
  0x64   :  { %6152 = vst [vmem:[#allocation55_spill] sm:$0xff] %v4477_v10  ;;  %6154 = vst [vmem:[#allocation57_spill] sm:$0xff] %v4491_v43  ;;  %v763_v10 = vrot.slane %v55_v40, %v4238_v26  ;;  %v4502_v54 = vrot.slane %v755_v30, %v4238_v26  ;;  %v4505_v25 = vrot.slane %v759_v17, %v4238_v26 }
  0x65   :  { %v771_v43 = vrot.slane %v4415_v41, %v4238_v26  ;;  %v775_v12 = vrot.slane %v4415_v41, %v4241_v27  ;;  %v4512_v49 = vrot.slane %v1111_v53, %v4260_v34  ;;  %v4515_v40 = vrot.slane %v1115_v9, %v4260_v34 }
  0x66   :  { %6155 = vst [vmem:[#allocation58_spill] sm:$0xff] %v4502_v54  ;;  %6156 = vst [vmem:[#allocation59_spill] sm:$0xff] %v4505_v25  ;;  %v4518_v15 = vrot.slane %v415_v16, %v4222_v14  ;;  %v4521_v30 = vrot.slane %v419_v56, %v4222_v14  ;;  %v4524_v13 = vrot.slane %v763_v10, %v4238_v26 }
  0x67   :  { %6157 = vst [vmem:[#allocation60_spill] sm:$0xff] %v4512_v49  ;;  %6158 = vst [vmem:[#allocation61_spill] sm:$0xff] %v4515_v40  ;;  %v4527_v17 = vrot.slane %v767_v52, %v4238_v26  ;;  %v4530_v27 = vrot.slane %v143_v45, %v4216_v11  ;;  %v4533_v53 = vrot.slane %v147_v21, %v4216_v11 }
  0x68   :  { %6159 = vst [vmem:[#allocation62_spill] sm:$0xff] %v4518_v15  ;;  %6160 = vst [vmem:[#allocation63_spill] sm:$0xff] %v4521_v30  ;;  %v4536_v9 = vrot.slane %v1119_v31, %v4260_v34  ;;  %v4539_v16 = vrot.slane %v1123_v20, %v4260_v34  ;;  %v4542_v56 = vrot.slane %v423_v24, %v4222_v14 }
  0x69   :  { %6161 = vst [vmem:[#allocation64_spill] sm:$0xff] %v4524_v13  ;;  %6162 = vst [vmem:[#allocation65_spill] sm:$0xff] %v4527_v17  ;;  %v4545_v10 = vrot.slane %v427_v51, %v4222_v14  ;;  %v4552_v45 = vrot.slane %v771_v43, %v4238_v26  ;;  %v4555_v21 = vrot.slane %v775_v12, %v4238_v26 }
  0x6a   :  { %6163 = vst [vmem:[#allocation66_spill] sm:$0xff] %v4530_v27  ;;  %6164 = vst [vmem:[#allocation67_spill] sm:$0xff] %v4533_v53 }
  0x6b   :  { %6165 = vst [vmem:[#allocation68_spill] sm:$0xff] %v4536_v9  ;;  %6166 = vst [vmem:[#allocation69_spill] sm:$0xff] %v4539_v16 }
  0x6c   :  { %6167 = vst [vmem:[#allocation70_spill] sm:$0xff] %v4542_v56  ;;  %6168 = vst [vmem:[#allocation71_spill] sm:$0xff] %v4545_v10 }
  0x6d   :  { %6171 = vst [vmem:[#allocation74_spill] sm:$0xff] %v4552_v45  ;;  %6172 = vst [vmem:[#allocation75_spill] sm:$0xff] %v4555_v21 }
  0xa8   :  { %v4547_v52 = vpop.permute.xlu1 %260  ;;  %v4549_v30 = vpop.permute.xlu0 %529 }
  0xa9   :  { %6169 = vst [vmem:[#allocation72_spill] sm:$0xff] %v4547_v52  ;;  %6170 = vst [vmem:[#allocation73_spill] sm:$0xff] %v4549_v30  ;;  %v4563_v24 = vmul.f32 %v4549_v30, %v4254_v32  ;;  %v4567_v51 = vmul.f32 %v4549_v30, %v4257_v33  ;;  %v4571_v43 = vmul.f32 %v4547_v52, %v4244_v28 }
  0xaa   :  { %v4575_v12 = vmul.f32 %v4547_v52, %v4247_v29  ;;  %v4579_v20 = vmul.f32 %v4549_v30, %v4272_v38  ;;  %v4583_v31 = vmul.f32 %v4549_v30, %v4275_v39  ;;  %v280_v14 = vmul.f32 %v4547_v52, %v4266_v36 }
  0xab   :  { %v281_v11 = vmul.f32 %v4547_v52, %v4269_v37  ;;  %v4591_v26 = vmul.f32 %v4549_v30, %v4308_v59  ;;  %v4595_v10 = vmul.f32 %v4549_v30, %v4311_v60  ;;  %v4599_v56 = vmul.f32 %v4547_v52, %v4286_v47 }
  0xac   :  { %v4603_v53 = vmul.f32 %v4547_v52, %v4289_v48  ;;  %v4605_v27 = vpop.permute.xlu1 %265  ;;  %v4607_v35 = vpop.permute.xlu0 %541  ;;  %v4611_v41 = vmul.f32 %v4549_v30, %v4352_v22  ;;  %v4615_v34 = vmul.f32 %v4549_v30, %v4355_v23  ;;  %v4619_v21 = vmul.f32 %v4547_v52, %v4340_v7 }
  0xad   :  { %6173 = vst [vmem:[#allocation76_spill] sm:$0xff] %v4591_v26  ;;  %6174 = vst [vmem:[#allocation77_spill] sm:$0xff] %v4595_v10  ;;  %v4623_v45 = vmul.f32 %v4547_v52, %v4343_v8  ;;  %v274_v15 = vmul.f32 %v4605_v27, %v4244_v28  ;;  %v275_v16 = vmul.f32 %v4605_v27, %v4247_v29  ;;  %v6214_v26 = vld [vmem:[#allocation27_spill] sm:$0xff] }
  0xae   :  { %6175 = vst [vmem:[#allocation78_spill] sm:$0xff] %v4605_v27  ;;  %6176 = vst [vmem:[#allocation79_spill] sm:$0xff] %v4607_v35  ;;  %v550_v9 = vmul.f32 %v4607_v35, %v4254_v32  ;;  %v551_v17 = vmul.f32 %v4607_v35, %v4257_v33  ;;  %v282_v13 = vmul.f32 %v4605_v27, %v4266_v36 }
  0xaf   :  { %6177 = vst [vmem:[#allocation80_spill] sm:$0xff] %v4611_v41  ;;  %6178 = vst [vmem:[#allocation81_spill] sm:$0xff] %v4615_v34  ;;  %v283_v40 = vmul.f32 %v4605_v27, %v4269_v37  ;;  %v558_v49 = vmul.f32 %v4607_v35, %v4272_v38  ;;  %v559_v25 = vmul.f32 %v4607_v35, %v4275_v39 }
  0xb0   :  { %v4641_v54 = vadd.f32 %v550_v9, %v274_v15  ;;  %v4643_v52 = vadd.f32 %v551_v17, %v275_v16  ;;  %v290_v50 = vmul.f32 %v4605_v27, %v4286_v47  ;;  %v291_v55 = vmul.f32 %v4605_v27, %v4289_v48 }
  0xb1   :  { %v4649_v42 = vadd.f32 %v558_v49, %v282_v13  ;;  %v4651_v34 = vadd.f32 %v559_v25, %v283_v40  ;;  %v566_v41 = vmul.f32 %v4607_v35, %v4308_v59  ;;  %v567_v8 = vmul.f32 %v4607_v35, %v4311_v60  ;;  %v4657_v15 = vpop.permute.xlu1 %533  ;;  %v4659_v17 = vpop.permute.xlu0 %889 }
  0xb2   :  { %6181 = vst [vmem:[#allocation84_spill] sm:$0xff] %v4657_v15  ;;  %6182 = vst [vmem:[#allocation85_spill] sm:$0xff] %v4659_v17  ;;  %v4663_v9 = vmul.f32 %v4549_v30, %v4394_v63  ;;  %v4667_v49 = vmul.f32 %v4549_v30, %v4397_v0  ;;  %v4671_v25 = vmul.f32 %v4549_v30, %v4406_v18 }
  0xb3   :  { %6179 = vst [vmem:[#allocation82_spill] sm:$0xff] %v4649_v42  ;;  %6180 = vst [vmem:[#allocation83_spill] sm:$0xff] %v4651_v34  ;;  %v4675_v40 = vmul.f32 %v4549_v30, %v4409_v19  ;;  %v4679_v13 = vmul.f32 %v4657_v15, %v4254_v32  ;;  %v4683_v16 = vmul.f32 %v4657_v15, %v4257_v33 }
  0xb4   :  { %6183 = vst [vmem:[#allocation86_spill] sm:$0xff] %v4663_v9  ;;  %6184 = vst [vmem:[#allocation87_spill] sm:$0xff] %v4667_v49  ;;  %v4687_v35 = vmul.f32 %v4659_v17, %v4302_v57  ;;  %v4691_v27 = vmul.f32 %v4659_v17, %v4305_v58  ;;  %v4695_v30 = vmul.f32 %v4657_v15, %v4272_v38 }
  0xb5   :  { %6185 = vst [vmem:[#allocation88_spill] sm:$0xff] %v4671_v25  ;;  %6186 = vst [vmem:[#allocation89_spill] sm:$0xff] %v4675_v40  ;;  %v4699_v40 = vmul.f32 %v4657_v15, %v4275_v39  ;;  %v4703_v25 = vmul.f32 %v4659_v17, %v4314_v61  ;;  %v4707_v19 = vmul.f32 %v4659_v17, %v4317_v62  ;;  %v4725_v63 = vpop.permute.xlu1 %537 }
  0xb6   :  { %6187 = vst [vmem:[#allocation90_spill] sm:$0xff] %v4695_v30  ;;  %v4711_v18 = vmul.f32 %v4657_v15, %v4308_v59  ;;  %v4715_v49 = vmul.f32 %v4657_v15, %v4311_v60  ;;  %v4719_v9 = vmul.f32 %v4659_v17, %v4334_v5  ;;  %v4723_v0 = vmul.f32 %v4659_v17, %v4337_v6  ;;  %v4739_v42 = vpop.permute.xlu0 %1241 }
  0xb7   :  { %6188 = vst [vmem:[#allocation91_spill] sm:$0xff] %v4699_v40  ;;  %6189 = vst [vmem:[#allocation92_spill] sm:$0xff] %v4703_v25  ;;  %v4727_v7 = vadd.f32 %v566_v41, %v290_v50  ;;  %v4729_v34 = vadd.f32 %v567_v8, %v291_v55  ;;  %v548_v17 = vmul.f32 %v4725_v63, %v4254_v32 }
  0xb8   :  { %6190 = vst [vmem:[#allocation93_spill] sm:$0xff] %v4707_v19  ;;  %6191 = vst [vmem:[#allocation94_spill] sm:$0xff] %v4711_v18  ;;  %v4733_v18 = vmul.f32 %v4657_v15, %v4352_v22  ;;  %v556_v8 = vmul.f32 %v4725_v63, %v4272_v38  ;;  %v557_v50 = vmul.f32 %v4725_v63, %v4275_v39  ;;  %v6216_v19 = vld [vmem:[#allocation28_spill] sm:$0xff] }
  0xb9   :  { %6192 = vst [vmem:[#allocation95_spill] sm:$0xff] %v4715_v49  ;;  %6193 = vst [vmem:[#allocation96_spill] sm:$0xff] %v4719_v9  ;;  %v4737_v49 = vmul.f32 %v4657_v15, %v4355_v23  ;;  %v4751_v55 = vmul.f32 %v4739_v42, %v4322_v1  ;;  %v4755_v41 = vmul.f32 %v4739_v42, %v4325_v2 }
  0xba   :  { %6194 = vst [vmem:[#allocation97_spill] sm:$0xff] %v4723_v0  ;;  %6195 = vst [vmem:[#allocation98_spill] sm:$0xff] %v4725_v63  ;;  %v549_v0 = vmul.f32 %v4725_v63, %v4257_v33  ;;  %v4759_v32 = vmul.f32 %v4739_v42, %v4328_v3  ;;  %v4763_v33 = vmul.f32 %v4739_v42, %v4331_v4  ;;  %v4779_v10 = vpop.permute.xlu1 %885 }
  0xbb   :  { %6196 = vst [vmem:[#allocation99_spill] sm:$0xff] %v4727_v7  ;;  %6197 = vst [vmem:[#allocation100_spill] sm:$0xff] %v4729_v34  ;;  %v628_v38 = vadd.f32 %v548_v17, %v4571_v43  ;;  %v636_v15 = vadd.f32 %v556_v8, %v280_v14  ;;  %v4773_v34 = vmul.f32 %v4739_v42, %v4371_v44  ;;  %v4781_v43 = vpop.permute.xlu0 %1253  ;;  %v6205_v14 = vld [vmem:[#allocation29_spill] sm:$0xff] }
  0xbc   :  { %6198 = vst [vmem:[#allocation101_spill] sm:$0xff] %v4733_v18  ;;  %6199 = vst [vmem:[#allocation102_spill] sm:$0xff] %v4737_v49  ;;  %v629_v39 = vadd.f32 %v549_v0, %v4575_v12  ;;  %v637_v49 = vadd.f32 %v557_v50, %v281_v11  ;;  %v4769_v18 = vmul.f32 %v4739_v42, %v4368_v46  ;;  %v6207_v0 = vld [vmem:[#allocation30_spill] sm:$0xff] }
  0xbd   :  { %6200 = vst [vmem:[#allocation103_spill] sm:$0xff] %v4739_v42  ;;  %6202 = vst [vmem:[#allocation105_spill] sm:$0xff] %v4773_v34  ;;  %v564_v7 = vmul.f32 %v4725_v63, %v4308_v59  ;;  %v565_v9 = vmul.f32 %v4725_v63, %v4311_v60  ;;  %v4785_v11 = vmul.f32 %v4739_v42, %v6205_v14 }
  0xbe   :  { %6201 = vst [vmem:[#allocation104_spill] sm:$0xff] %v4769_v18  ;;  %6203 = vst [vmem:[#allocation106_spill] sm:$0xff] %v4779_v10  ;;  %v4789_v12 = vmul.f32 %v4739_v42, %v6207_v0  ;;  %v572_v17 = vmul.f32 %v4725_v63, %v4352_v22  ;;  %v573_v59 = vmul.f32 %v4725_v63, %v4355_v23  ;;  %v4829_v18 = vpop.permute.xlu1 %893 }
  0xbf   :  { %6204 = vst [vmem:[#allocation107_spill] sm:$0xff] %v4781_v43  ;;  %6206 = vst [vmem:[#allocation108_spill] sm:$0xff] %v4785_v11  ;;  %v900_v60 = vmul.f32 %v4779_v10, %v4302_v57  ;;  %v901_v8 = vmul.f32 %v4779_v10, %v4305_v58  ;;  %v4801_v50 = vmul.f32 %v4779_v10, %v4314_v61 }
  0xc0   :  { %6208 = vst [vmem:[#allocation109_spill] sm:$0xff] %v4789_v12  ;;  %v4805_v42 = vmul.f32 %v4779_v10, %v4317_v62  ;;  %v1262_v22 = vmul.f32 %v4781_v43, %v4322_v1  ;;  %v1263_v23 = vmul.f32 %v4781_v43, %v4325_v2  ;;  %v4813_v63 = vmul.f32 %v4779_v10, %v4334_v5 }
  0xc1   :  { %v4817_v12 = vmul.f32 %v4779_v10, %v4337_v6  ;;  %v4821_v11 = vmul.f32 %v4781_v43, %v4328_v3  ;;  %v4825_v0 = vmul.f32 %v4781_v43, %v4331_v4  ;;  %v644_v14 = vadd.f32 %v564_v7, %v4599_v56  ;;  %6213 = vst [vmem:[#allocation114_spill] sm:$0xff] %v4829_v18  ;;  %v4847_v7 = vpop.permute.xlu0 %1421 }
  0xc2   :  { %6209 = vst [vmem:[#allocation110_spill] sm:$0xff] %v4813_v63  ;;  %v645_v34 = vadd.f32 %v565_v9, %v4603_v53  ;;  %v4833_v63 = vmul.f32 %v4779_v10, %v6214_v26  ;;  %6220 = vst [vmem:[#allocation117_spill] sm:$0xff] %v4847_v7  ;;  %v904_v53 = vmul.f32 %v4829_v18, %v4302_v57  ;;  %v4863_v25 = vpop.permute.xlu1 %897 }
  0xc3   :  { %6210 = vst [vmem:[#allocation111_spill] sm:$0xff] %v4817_v12  ;;  %6211 = vst [vmem:[#allocation112_spill] sm:$0xff] %v4821_v11  ;;  %v4837_v12 = vmul.f32 %v4779_v10, %v6216_v19  ;;  %v4841_v11 = vmul.f32 %v4781_v43, %v4368_v46  ;;  %v905_v56 = vmul.f32 %v4829_v18, %v4305_v58 }
  0xc4   :  { %6212 = vst [vmem:[#allocation113_spill] sm:$0xff] %v4825_v0  ;;  %6215 = vst [vmem:[#allocation27_spill] sm:$0xff] %v4833_v63  ;;  %v4845_v0 = vmul.f32 %v4781_v43, %v4371_v44  ;;  %v912_v9 = vmul.f32 %v4829_v18, %v4314_v61  ;;  %v913_v10 = vmul.f32 %v4829_v18, %v4317_v62 }
  0xc5   :  { %6217 = vst [vmem:[#allocation28_spill] sm:$0xff] %v4837_v12  ;;  %6218 = vst [vmem:[#allocation115_spill] sm:$0xff] %v4841_v11  ;;  %v920_v12 = vmul.f32 %v4829_v18, %v4334_v5  ;;  %v921_v43 = vmul.f32 %v4829_v18, %v4337_v6  ;;  %v652_v63 = vadd.f32 %v572_v17, %v4619_v21 }
  0xc6   :  { %6219 = vst [vmem:[#allocation116_spill] sm:$0xff] %v4845_v0  ;;  %v653_v0 = vadd.f32 %v573_v59, %v4623_v45  ;;  %v984_v11 = vadd.f32 %v904_v53, %v628_v38  ;;  %v985_v44 = vadd.f32 %v905_v56, %v629_v39  ;;  %v992_v46 = vadd.f32 %v912_v9, %v636_v15  ;;  %v4885_v15 = vpop.permute.xlu0 %250 }
  0xc7   :  { %v993_v7 = vadd.f32 %v913_v10, %v637_v49  ;;  %v4865_v40 = vadd.f32 %v920_v12, %v644_v14  ;;  %v4867_v30 = vadd.f32 %v921_v43, %v645_v34  ;;  %v928_v4 = vmul.f32 %v4829_v18, %v6214_v26 }
  0xc8   :  { %v929_v3 = vmul.f32 %v4829_v18, %v6216_v19  ;;  %v906_v21 = vmul.f32 %v4863_v25, %v4302_v57  ;;  %v907_v45 = vmul.f32 %v4863_v25, %v4305_v58  ;;  %v4879_v10 = vmul.f32 %v4863_v25, %v4314_v61 }
  0xc9   :  { %v4883_v34 = vmul.f32 %v4863_v25, %v4317_v62  ;;  %v4889_v49 = vmul.f32 %v4863_v25, %v4334_v5  ;;  %v4893_v57 = vmul.f32 %v4863_v25, %v4337_v6  ;;  %v4895_v38 = vadd.f32 %v928_v4, %v652_v63  ;;  %v4917_v63 = vpop.permute.xlu1 %1245 }
  0xca   :  { %v4897_v58 = vadd.f32 %v929_v3, %v653_v0  ;;  %v268_v61 = vmul.f32 %v4885_v15, %v4244_v28  ;;  %v269_v62 = vmul.f32 %v4885_v15, %v4247_v29  ;;  %v276_v39 = vmul.f32 %v4885_v15, %v4266_v36  ;;  %v4923_v17 = vpop.permute.xlu0 %255 }
  0xcb   :  { %v277_v5 = vmul.f32 %v4885_v15, %v4269_v37  ;;  %v986_v43 = vadd.f32 %v906_v21, %v4641_v54  ;;  %v987_v6 = vadd.f32 %v907_v45, %v4643_v52  ;;  %v4911_v3 = vmul.f32 %v4885_v15, %v4286_v47 }
  0xcc   :  { %v4915_v4 = vmul.f32 %v4885_v15, %v4289_v48  ;;  %v624_v14 = vadd.f32 %v4563_v24, %v268_v61  ;;  %v625_v0 = vadd.f32 %v4567_v51, %v269_v62  ;;  %v632_v12 = vadd.f32 %v4579_v20, %v276_v39  ;;  %v6222_v62 = vld [vmem:[#allocation19_spill] sm:$0xff] }
  0xcd   :  { %v633_v54 = vadd.f32 %v4583_v31, %v277_v5  ;;  %v1258_v52 = vmul.f32 %v4917_v63, %v4322_v1  ;;  %v1259_v59 = vmul.f32 %v4917_v63, %v4325_v2  ;;  %v4929_v53 = vadd.f32 %v1262_v22, %v986_v43 }
  0xce   :  { %v4931_v56 = vadd.f32 %v1263_v23, %v987_v6  ;;  %v980_v9 = vadd.f32 %v900_v60, %v624_v14  ;;  %v981_v24 = vadd.f32 %v901_v8, %v625_v0  ;;  %v270_v51 = vmul.f32 %v4923_v17, %v4244_v28  ;;  %v4943_v23 = vpop.permute.xlu1 %1249  ;;  %v6225_v6 = vld [vmem:[#allocation91_spill] sm:$0xff] }
  0xcf   :  { %v271_v20 = vmul.f32 %v4923_v17, %v4247_v29  ;;  %v988_v31 = vadd.f32 %v4801_v50, %v632_v12  ;;  %v989_v21 = vadd.f32 %v4805_v42, %v633_v54  ;;  %v278_v45 = vmul.f32 %v4923_v17, %v4266_v36  ;;  %6221 = vst [vmem:[#allocation118_spill] sm:$0xff] %v4943_v23  ;;  %v6227_v54 = vld [vmem:[#allocation93_spill] sm:$0xff] }
  0xd0   :  { %v279_v22 = vmul.f32 %v4923_v17, %v4269_v37  ;;  %v1336_v60 = vadd.f32 %v4751_v55, %v980_v9  ;;  %v1337_v8 = vadd.f32 %v4755_v41, %v981_v24  ;;  %v626_v28 = vadd.f32 %v4679_v13, %v270_v51  ;;  %v6223_v13 = vld [vmem:[#allocation20_spill] sm:$0xff] }
  0xd1   :  { %v627_v29 = vadd.f32 %v4683_v16, %v271_v20  ;;  %v1260_v50 = vmul.f32 %v4943_v23, %v4322_v1  ;;  %v1261_v42 = vmul.f32 %v4943_v23, %v4325_v2  ;;  %v1344_v36 = vadd.f32 %v4759_v32, %v988_v31  ;;  %v6224_v1 = vld [vmem:[#allocation90_spill] sm:$0xff] }
  0xd2   :  { %v1345_v37 = vadd.f32 %v4763_v33, %v989_v21  ;;  %v982_v61 = vadd.f32 %v4687_v35, %v626_v28  ;;  %v1268_v41 = vmul.f32 %v4943_v23, %v6222_v62  ;;  %v1269_v16 = vmul.f32 %v4943_v23, %v6223_v13  ;;  %v4963_v12 = vpop.permute.xlu1 %1417  ;;  %v6226_v35 = vld [vmem:[#allocation92_spill] sm:$0xff] }
  0xd3   :  { %v983_v55 = vadd.f32 %v4691_v27, %v627_v29  ;;  %v1340_v39 = vadd.f32 %v1260_v50, %v984_v11  ;;  %v1341_v5 = vadd.f32 %v1261_v42, %v985_v44  ;;  %v634_v43 = vadd.f32 %v6224_v1, %v278_v45 }
  0xd4   :  { %v635_v2 = vadd.f32 %v6225_v6, %v279_v22  ;;  %v1338_v14 = vadd.f32 %v1258_v52, %v982_v61  ;;  %v1348_v0 = vadd.f32 %v1268_v41, %v992_v46  ;;  %v1349_v33 = vadd.f32 %v1269_v16, %v993_v7  ;;  %v6228_v52 = vld [vmem:[#allocation117_spill] sm:$0xff] }
  0xd5   :  { %v1339_v32 = vadd.f32 %v1259_v59, %v983_v55  ;;  %v990_v27 = vadd.f32 %v6226_v35, %v634_v43  ;;  %v1266_v24 = vmul.f32 %v4917_v63, %v6222_v62  ;;  %v1267_v44 = vmul.f32 %v4917_v63, %v6223_v13 }
  0xd6   :  { %v991_v9 = vadd.f32 %v6227_v54, %v635_v2  ;;  %v1432_v11 = vadd.f32 %v4963_v12, %v1336_v60  ;;  %v1433_v51 = vadd.f32 %v4963_v12, %v1337_v8  ;;  %v1434_v59 = vadd.f32 %v6228_v52, %v1338_v14  ;;  %v4977_v50 = vpop.permute.xlu1 %1425  ;;  %v6230_v14 = vld [vmem:[#allocation76_spill] sm:$0xff] }
  0xd7   :  { %v1435_v46 = vadd.f32 %v6228_v52, %v1339_v32  ;;  %v1440_v7 = vadd.f32 %v4963_v12, %v1344_v36  ;;  %v1441_v20 = vadd.f32 %v4963_v12, %v1345_v37  ;;  %v1346_v31 = vadd.f32 %v1266_v24, %v990_v27  ;;  %6229 = vst [vmem:[#allocation19_spill] sm:$0xff] %v4977_v50 }
  0xd8   :  { %v1347_v21 = vadd.f32 %v1267_v44, %v991_v9  ;;  %v1512_v45 = vmax.f32 %v1432_v11, 0.0  ;;  %v1513_v22 = vmax.f32 %v1433_v51, 0.0  ;;  %v1514_v28 = vmax.f32 %v1434_v59, 0.0  ;;  %v6232_v9 = vld [vmem:[#allocation82_spill] sm:$0xff] }
  0xd9   :  { %v1515_v29 = vmax.f32 %v1435_v46, 0.0  ;;  %v1520_v42 = vmax.f32 %v1440_v7, 0.0  ;;  %v1521_v60 = vmax.f32 %v1441_v20, 0.0  ;;  %v1442_v8 = vadd.f32 %v6228_v52, %v1346_v31  ;;  %v6234_v46 = vld [vmem:[#allocation111_spill] sm:$0xff] }
  0xda   :  { %v1443_v61 = vadd.f32 %v6228_v52, %v1347_v21  ;;  %v1592_v55 = vadd.f32 %v1513_v22, %v1512_v45  ;;  %v1436_v36 = vadd.f32 %v4977_v50, %v1340_v39  ;;  %v1437_v37 = vadd.f32 %v4977_v50, %v1341_v5  ;;  %v4987_v35 = vpop.permute.xlu1 %1429  ;;  %v6231_v5 = vld [vmem:[#allocation77_spill] sm:$0xff]  ;;  %v6235_v20 = vld [vmem:[#allocation83_spill] sm:$0xff]  ;;  %v6236_v21 = vld [vmem:[#allocation112_spill] sm:$0xff] }
  0xdb   :  { %v1595_v62 = vadd.f32 %v1515_v29, %v1514_v28  ;;  %v1604_v41 = vadd.f32 %v1521_v60, %v1520_v42  ;;  %v1444_v13 = vadd.f32 %v4977_v50, %v1348_v0  ;;  %v1445_v16 = vadd.f32 %v4977_v50, %v1349_v33  ;;  %v6237_v22 = vld [vmem:[#allocation25_spill] sm:$0xff]  ;;  %v6238_v28 = vld [vmem:[#allocation104_spill] sm:$0xff] }
  0xdc   :  { %v1522_v1 = vmax.f32 %v1442_v8, 0.0  ;;  %1593 = vadd.xlane.f32.xlu0 %v1592_v55  ;;  %v1516_v43 = vmax.f32 %v1436_v36, 0.0  ;;  %v1517_v6 = vmax.f32 %v1437_v37, 0.0  ;;  %v1523_v2 = vmax.f32 %v1443_v61, 0.0  ;;  %v6239_v29 = vld [vmem:[#allocation105_spill] sm:$0xff]  ;;  %v6241_v61 = vld [vmem:[#allocation26_spill] sm:$0xff] }
  0xdd   :  { %1596 = vadd.xlane.f32.xlu1 %v1595_v62  ;;  %v640_v32 = vadd.f32 %v6230_v14, %v4911_v3  ;;  %v1524_v27 = vmax.f32 %v1444_v13, 0.0  ;;  %v1525_v39 = vmax.f32 %v1445_v16, 0.0  ;;  %v641_v54 = vadd.f32 %v6231_v5, %v4915_v4  ;;  %v6233_v3 = vld [vmem:[#allocation110_spill] sm:$0xff]  ;;  %v6240_v60 = vld [vmem:[#allocation113_spill] sm:$0xff] }
  0xde   :  { %v994_v0 = vadd.f32 %v4879_v10, %v6232_v9  ;;  %v1598_v33 = vadd.f32 %v1517_v6, %v1516_v43  ;;  %v1438_v24 = vadd.f32 %v4987_v35, %v4929_v53  ;;  %v1439_v44 = vadd.f32 %v4987_v35, %v4931_v56 }
  0xdf   :  { %v1607_v11 = vadd.f32 %v1523_v2, %v1522_v1  ;;  %v1610_v51 = vadd.f32 %v1525_v39, %v1524_v27  ;;  %v996_v59 = vadd.f32 %v6233_v3, %v640_v32  ;;  %v997_v7 = vadd.f32 %v6234_v46, %v641_v54  ;;  %v6243_v54 = vld [vmem:[#allocation95_spill] sm:$0xff]  ;;  %v6245_v3 = vld [vmem:[#allocation97_spill] sm:$0xff] }
  0xe0   :  { %v995_v31 = vadd.f32 %v4883_v34, %v6235_v20  ;;  %1599 = vadd.xlane.f32.xlu0 %v1598_v33  ;;  %v1518_v4 = vmax.f32 %v1438_v24, 0.0  ;;  %v1519_v10 = vmax.f32 %v1439_v44, 0.0  ;;  %v1350_v45 = vadd.f32 %v6236_v21, %v994_v0  ;;  %v6244_v0 = vld [vmem:[#allocation96_spill] sm:$0xff]  ;;  %v6248_v21 = vld [vmem:[#allocation99_spill] sm:$0xff] }
  0xe1   :  { %1605 = vadd.xlane.f32.xlu1 %v1604_v41  ;;  %v1276_v53 = vmul.f32 %v4943_v23, %v6237_v22  ;;  %v1352_v56 = vadd.f32 %v6238_v28, %v996_v59  ;;  %v1353_v42 = vadd.f32 %v6239_v29, %v997_v7  ;;  %v1277_v55 = vmul.f32 %v4943_v23, %v6241_v61  ;;  %v6246_v7 = vld [vmem:[#allocation21_spill] sm:$0xff] }
  0xe2   :  { %v1351_v8 = vadd.f32 %v6240_v60, %v995_v31  ;;  %v1601_v62 = vadd.f32 %v1519_v10, %v1518_v4  ;;  %v1446_v34 = vadd.f32 %v4987_v35, %v1350_v45  ;;  %v286_v37 = vmul.f32 %v4923_v17, %v4286_v47  ;;  %v6247_v31 = vld [vmem:[#allocation22_spill] sm:$0xff]  ;;  %v6250_v28 = vld [vmem:[#allocation29_spill] sm:$0xff] }
  0xe3   :  { %v1356_v36 = vadd.f32 %v1276_v53, %v4865_v40  ;;  %v1448_v41 = vadd.f32 %v4963_v12, %v1352_v56  ;;  %v1449_v13 = vadd.f32 %v4963_v12, %v1353_v42  ;;  %v1357_v1 = vadd.f32 %v1277_v55, %v4867_v30  ;;  %v6242_v40 = vld [vmem:[#allocation94_spill] sm:$0xff]  ;;  %v6251_v42 = vld [vmem:[#allocation80_spill] sm:$0xff]  ;;  %v6253_v55 = vld [vmem:[#allocation115_spill] sm:$0xff] }
  0xe4   :  { %v1447_v16 = vadd.f32 %v4987_v35, %v1351_v8  ;;  %1602 = vadd.xlane.f32.xlu0 %v1601_v62  ;;  %v1526_v43 = vmax.f32 %v1446_v34, 0.0  ;;  %v287_v2 = vmul.f32 %v4923_v17, %v4289_v48  ;;  %v642_v14 = vadd.f32 %v6242_v40, %v286_v37  ;;  %v6252_v8 = vld [vmem:[#allocation81_spill] sm:$0xff]  ;;  %v6254_v34 = vld [vmem:[#allocation116_spill] sm:$0xff]  ;;  %v6255_v37 = vld [vmem:[#allocation30_spill] sm:$0xff] }
  0xe5   :  { %1611 = vadd.xlane.f32.xlu1 %v1610_v51  ;;  %v1452_v6 = vadd.f32 %v4977_v50, %v1356_v36  ;;  %v1528_v32 = vmax.f32 %v1448_v41, 0.0  ;;  %v1529_v47 = vmax.f32 %v1449_v13, 0.0  ;;  %v1453_v39 = vadd.f32 %v4977_v50, %v1357_v1 }
  0xe6   :  { %v1527_v27 = vmax.f32 %v1447_v16, 0.0  ;;  %v643_v9 = vadd.f32 %v6243_v54, %v287_v2  ;;  %v998_v30 = vadd.f32 %v6244_v0, %v642_v14  ;;  %v1274_v33 = vmul.f32 %v4917_v63, %v6237_v22  ;;  %v6249_v22 = vld [vmem:[#allocation100_spill] sm:$0xff]  ;;  %v6256_v16 = vld [vmem:[#allocation27_spill] sm:$0xff] }
  0xe7   :  { %v1532_v5 = vmax.f32 %v1452_v6, 0.0  ;;  %v1616_v24 = vadd.f32 %v1529_v47, %v1528_v32  ;;  %v1533_v51 = vmax.f32 %v1453_v39, 0.0  ;;  %v1275_v48 = vmul.f32 %v4917_v63, %v6241_v61  ;;  %v6259_v39 = vld [vmem:[#allocation109_spill] sm:$0xff] }
  0xe8   :  { %v1613_v44 = vadd.f32 %v1527_v27, %v1526_v43  ;;  %1608 = vadd.xlane.f32.xlu0 %v1607_v11  ;;  %v999_v59 = vadd.f32 %v6245_v3, %v643_v9  ;;  %v1354_v46 = vadd.f32 %v1274_v33, %v998_v30  ;;  %v292_v20 = vmul.f32 %v4885_v15, %v6246_v7  ;;  %v6257_v43 = vld [vmem:[#allocation28_spill] sm:$0xff] }
  0xe9   :  { %v293_v4 = vmul.f32 %v4885_v15, %v6247_v31  ;;  %1617 = vadd.xlane.f32.xlu1 %v1616_v24  ;;  %v1622_v10 = vadd.f32 %v1533_v51, %v1532_v5  ;;  %v1002_v45 = vadd.f32 %v4889_v49, %v6248_v21  ;;  %v1003_v53 = vadd.f32 %v4893_v57, %v6249_v22  ;;  %v6258_v27 = vld [vmem:[#allocation108_spill] sm:$0xff] }
  0xea   :  { %v1284_v11 = vmul.f32 %v4943_v23, %v6250_v28  ;;  %v1355_v56 = vadd.f32 %v1275_v48, %v999_v59  ;;  %v1450_v29 = vadd.f32 %v6228_v52, %v1354_v46  ;;  %v648_v60 = vadd.f32 %v6251_v42, %v292_v20  ;;  %v6260_v59 = vld [vmem:[#allocation101_spill] sm:$0xff] }
  0xeb   :  { %v649_v61 = vadd.f32 %v6252_v8, %v293_v4  ;;  %v1358_v62 = vadd.f32 %v6253_v55, %v1002_v45  ;;  %v1359_v36 = vadd.f32 %v6254_v34, %v1003_v53  ;;  %v1285_v49 = vmul.f32 %v4943_v23, %v6255_v37  ;;  %v6261_v20 = vld [vmem:[#allocation85_spill] sm:$0xff]  ;;  %v6262_v45 = vld [vmem:[#allocation102_spill] sm:$0xff] }
  0xec   :  { %v1364_v41 = vadd.f32 %v1284_v11, %v4895_v38  ;;  %1614 = vadd.xlane.f32.xlu0 %v1613_v44  ;;  %v1451_v57 = vadd.f32 %v6228_v52, %v1355_v56  ;;  %v1530_v13 = vmax.f32 %v1450_v29, 0.0  ;;  %v1004_v1 = vadd.f32 %v6256_v16, %v648_v60 }
  0xed   :  { %v1005_v6 = vadd.f32 %v6257_v43, %v649_v61  ;;  %1623 = vadd.xlane.f32.xlu1 %v1622_v10  ;;  %v1454_v2 = vadd.f32 %v4987_v35, %v1358_v62  ;;  %v1455_v40 = vadd.f32 %v4987_v35, %v1359_v36  ;;  %v1365_v14 = vadd.f32 %v1285_v49, %v4897_v58  ;;  %v6263_v61 = vld [vmem:[#allocation31_spill] sm:$0xff]  ;;  %v6264_v62 = vld [vmem:[#allocation32_spill] sm:$0xff]  ;;  %v6265_v49 = vld [vmem:[#allocation33_spill] sm:$0xff] }
  0xee   :  { %v1460_v32 = vadd.f32 %v4977_v50, %v1364_v41  ;;  %v1531_v47 = vmax.f32 %v1451_v57, 0.0  ;;  %v1360_v38 = vadd.f32 %v6258_v27, %v1004_v1  ;;  %v294_v54 = vmul.f32 %v4923_v17, %v6246_v7  ;;  %v6266_v41 = vld [vmem:[#allocation84_spill] sm:$0xff] }
  0xef   :  { %v1361_v5 = vadd.f32 %v6259_v39, %v1005_v6  ;;  %v1534_v9 = vmax.f32 %v1454_v2, 0.0  ;;  %v1535_v0 = vmax.f32 %v1455_v40, 0.0  ;;  %v1461_v30 = vadd.f32 %v4977_v50, %v1365_v14  ;;  %v6268_v1 = vld [vmem:[#allocation40_spill] sm:$0xff]  ;;  %v6269_v2 = vld [vmem:[#allocation41_spill] sm:$0xff]  ;;  %v6270_v14 = vld [vmem:[#allocation42_spill] sm:$0xff] }
  0xf0   :  { %v1540_v33 = vmax.f32 %v1460_v32, 0.0  ;;  %v1619_v24 = vadd.f32 %v1531_v47, %v1530_v13  ;;  %v1456_v44 = vadd.f32 %v4963_v12, %v1360_v38  ;;  %v295_v51 = vmul.f32 %v4923_v17, %v6247_v31  ;;  %v6267_v13 = vld [vmem:[#allocation34_spill] sm:$0xff]  ;;  %v6271_v39 = vld [vmem:[#allocation43_spill] sm:$0xff] }
  0xf1   :  { %v1457_v58 = vadd.f32 %v4963_v12, %v1361_v5  ;;  %v1625_v48 = vadd.f32 %v1535_v0, %v1534_v9  ;;  %v1541_v3 = vmax.f32 %v1461_v30, 0.0  ;;  %v650_v46 = vadd.f32 %v6260_v59, %v294_v54  ;;  %v6272_v30 = vld [vmem:[#allocation106_spill] sm:$0xff] }
  0xf2   :  { %v926_v4 = vmul.f32 %v6261_v20, %v6214_v26  ;;  %1620 = vadd.xlane.f32.xlu0 %v1619_v24  ;;  %v1536_v10 = vmax.f32 %v1456_v44, 0.0  ;;  %v651_v22 = vadd.f32 %v6262_v45, %v295_v51  ;;  %v927_v53 = vmul.f32 %v6261_v20, %v6216_v19 }
  0xf3   :  { %v1537_v21 = vmax.f32 %v1457_v58, 0.0  ;;  %v1634_v11 = vadd.f32 %v1541_v3, %v1540_v33  ;;  %v1282_v29 = vmul.f32 %v4917_v63, %v6250_v28  ;;  %v1283_v42 = vmul.f32 %v4917_v63, %v6255_v37  ;;  %v6273_v3 = vld [vmem:[#allocation86_spill] sm:$0xff] }
  0xf4   :  { %v1006_v56 = vadd.f32 %v926_v4, %v650_v46  ;;  %v1007_v8 = vadd.f32 %v927_v53, %v651_v22  ;;  %v302_v55 = vmul.f32 %v4923_v17, %v6263_v61  ;;  %v303_v34 = vmul.f32 %v4923_v17, %v6264_v62  ;;  %v6274_v46 = vld [vmem:[#allocation87_spill] sm:$0xff] }
  0xf5   :  { %v1628_v60 = vadd.f32 %v1537_v21, %v1536_v10  ;;  %v578_v57 = vmul.f32 %v6266_v41, %v6265_v49  ;;  %v579_v16 = vmul.f32 %v6266_v41, %v6267_v13  ;;  %v934_v43 = vmul.f32 %v6261_v20, %v6268_v1  ;;  %v6275_v10 = vld [vmem:[#allocation103_spill] sm:$0xff] }
  0xf6   :  { %v1362_v36 = vadd.f32 %v1282_v29, %v1006_v56  ;;  %1626 = vadd.xlane.f32.xlu0 %v1625_v48  ;;  %v1363_v6 = vadd.f32 %v1283_v42, %v1007_v8  ;;  %v935_v40 = vmul.f32 %v6261_v20, %v6269_v2  ;;  %v1290_v32 = vmul.f32 %v4917_v63, %v6270_v14  ;;  %v6276_v56 = vld [vmem:[#allocation35_spill] sm:$0xff] }
  0xf7   :  { %1629 = vadd.xlane.f32.xlu1 %v1628_v60  ;;  %v658_v27 = vadd.f32 %v578_v57, %v302_v55  ;;  %v659_v38 = vadd.f32 %v579_v16, %v303_v34  ;;  %v1291_v5 = vmul.f32 %v4917_v63, %v6271_v39  ;;  %v300_v9 = vmul.f32 %v4885_v15, %v6263_v61  ;;  %v6278_v57 = vld [vmem:[#allocation37_spill] sm:$0xff] }
  0xf8   :  { %v1458_v47 = vadd.f32 %v6228_v52, %v1362_v36  ;;  %v1459_v54 = vadd.f32 %v6228_v52, %v1363_v6  ;;  %v301_v0 = vmul.f32 %v4885_v15, %v6264_v62  ;;  %v932_v33 = vmul.f32 %v6272_v30, %v6268_v1 }
  0xf9   :  { %v1014_v44 = vadd.f32 %v934_v43, %v658_v27  ;;  %v1015_v58 = vadd.f32 %v935_v40, %v659_v38  ;;  %v933_v51 = vmul.f32 %v6272_v30, %v6269_v2  ;;  %v656_v59 = vadd.f32 %v6273_v3, %v300_v9  ;;  %v6279_v43 = vld [vmem:[#allocation38_spill] sm:$0xff]  ;;  %v6281_v38 = vld [vmem:[#allocation45_spill] sm:$0xff] }
  0xfa   :  { %v1538_v24 = vmax.f32 %v1458_v47, 0.0  ;;  %v1539_v48 = vmax.f32 %v1459_v54, 0.0  ;;  %v657_v4 = vadd.f32 %v6274_v46, %v301_v0  ;;  %v1288_v21 = vmul.f32 %v6275_v10, %v6270_v14  ;;  %v6280_v47 = vld [vmem:[#allocation44_spill] sm:$0xff] }
  0xfb   :  { %1635 = vadd.xlane.f32.xlu1 %v1634_v11  ;;  %v1370_v45 = vadd.f32 %v1290_v32, %v1014_v44  ;;  %v1371_v22 = vadd.f32 %v1291_v5, %v1015_v58  ;;  %v1289_v53 = vmul.f32 %v6275_v10, %v6271_v39  ;;  %v310_v29 = vmul.f32 %v4923_v17, %v6276_v56  ;;  %v6277_v11 = vld [vmem:[#allocation36_spill] sm:$0xff]  ;;  %v6282_v58 = vld [vmem:[#allocation46_spill] sm:$0xff] }
  0xfc   :  { %v1631_v42 = vadd.f32 %v1539_v48, %v1538_v24  ;;  %v1012_v60 = vadd.f32 %v932_v33, %v656_v59  ;;  %v1013_v8 = vadd.f32 %v933_v51, %v657_v4  ;;  %v311_v55 = vmul.f32 %v4923_v17, %v6277_v11  ;;  %v6283_v48 = vld [vmem:[#allocation47_spill] sm:$0xff] }
  0xfd   :  { %v1466_v34 = vadd.f32 %v6228_v52, %v1370_v45  ;;  %v1467_v36 = vadd.f32 %v6228_v52, %v1371_v22  ;;  %v586_v16 = vmul.f32 %v6266_v41, %v6278_v57  ;;  %v587_v6 = vmul.f32 %v6266_v41, %v6279_v43 }
  0xfe   :  { %1632 = vadd.xlane.f32.xlu0 %v1631_v42  ;;  %v1368_v40 = vadd.f32 %v1288_v21, %v1012_v60  ;;  %v1369_v32 = vadd.f32 %v1289_v53, %v1013_v8  ;;  %v942_v27 = vmul.f32 %v6261_v20, %v6280_v47  ;;  %v943_v5 = vmul.f32 %v6261_v20, %v6281_v38  ;;  %v6284_v8 = vld [vmem:[#allocation88_spill] sm:$0xff] }
  0xff   :  { %v1546_v54 = vmax.f32 %v1466_v34, 0.0  ;;  %v1547_v9 = vmax.f32 %v1467_v36, 0.0  ;;  %v666_v0 = vadd.f32 %v586_v16, %v310_v29  ;;  %v667_v33 = vadd.f32 %v587_v6, %v311_v55  ;;  %v6285_v16 = vld [vmem:[#allocation89_spill] sm:$0xff] }
 0x100   :  { %v1464_v24 = vadd.f32 %v4963_v12, %v1368_v40  ;;  %v1465_v44 = vadd.f32 %v4963_v12, %v1369_v32  ;;  %v1298_v51 = vmul.f32 %v4917_v63, %v6282_v58  ;;  %v1299_v3 = vmul.f32 %v4917_v63, %v6283_v48 }
 0x101   :  { %v1643_v59 = vadd.f32 %v1547_v9, %v1546_v54  ;;  %v1022_v46 = vadd.f32 %v942_v27, %v666_v0  ;;  %v1023_v4 = vadd.f32 %v943_v5, %v667_v33  ;;  %v308_v21 = vmul.f32 %v4885_v15, %v6276_v56  ;;  %v6286_v9 = vld [vmem:[#allocation72_spill] sm:$0xff] }
 0x102   :  { %v1544_v45 = vmax.f32 %v1464_v24, 0.0  ;;  %v1545_v22 = vmax.f32 %v1465_v44, 0.0  ;;  %v309_v53 = vmul.f32 %v4885_v15, %v6277_v11  ;;  %v940_v29 = vmul.f32 %v6272_v30, %v6280_v47  ;;  %v6287_v44 = vld [vmem:[#allocation98_spill] sm:$0xff] }
 0x103   :  { %1644 = vadd.xlane.f32.xlu1 %v1643_v59  ;;  %v1378_v42 = vadd.f32 %v1298_v51, %v1022_v46  ;;  %v1379_v60 = vadd.f32 %v1299_v3, %v1023_v4  ;;  %v664_v55 = vadd.f32 %v6284_v8, %v308_v21  ;;  %v941_v34 = vmul.f32 %v6272_v30, %v6281_v38 }
 0x104   :  { %v1640_v36 = vadd.f32 %v1545_v22, %v1544_v45  ;;  %v665_v6 = vadd.f32 %v6285_v16, %v309_v53  ;;  %v1296_v40 = vmul.f32 %v6275_v10, %v6282_v58  ;;  %v1297_v32 = vmul.f32 %v6275_v10, %v6283_v48 }
 0x105   :  { %v1474_v27 = vadd.f32 %v6228_v52, %v1378_v42  ;;  %v1475_v5 = vadd.f32 %v6228_v52, %v1379_v60  ;;  %v1020_v54 = vadd.f32 %v940_v29, %v664_v55  ;;  %v304_v0 = vmul.f32 %v6286_v9, %v6263_v61 }
 0x106   :  { %1641 = vadd.xlane.f32.xlu0 %v1640_v36  ;;  %v1021_v33 = vadd.f32 %v941_v34, %v665_v6  ;;  %v305_v24 = vmul.f32 %v6286_v9, %v6264_v62  ;;  %v580_v51 = vmul.f32 %v6287_v44, %v6265_v49  ;;  %v581_v3 = vmul.f32 %v6287_v44, %v6267_v13  ;;  %v6288_v6 = vld [vmem:[#allocation78_spill] sm:$0xff] }
 0x107   :  { %v1554_v59 = vmax.f32 %v1474_v27, 0.0  ;;  %v1555_v46 = vmax.f32 %v1475_v5, 0.0  ;;  %v1376_v4 = vadd.f32 %v1296_v40, %v1020_v54  ;;  %v936_v21 = vmul.f32 %v4829_v18, %v6268_v1  ;;  %v6289_v5 = vld [vmem:[#allocation23_spill] sm:$0xff] }
 0x108   :  { %v1377_v45 = vadd.f32 %v1297_v32, %v1021_v33  ;;  %v660_v22 = vadd.f32 %v580_v51, %v304_v0  ;;  %v661_v53 = vadd.f32 %v581_v3, %v305_v24  ;;  %v937_v29 = vmul.f32 %v4829_v18, %v6269_v2  ;;  %v6290_v54 = vld [vmem:[#allocation79_spill] sm:$0xff]  ;;  %v6291_v33 = vld [vmem:[#allocation24_spill] sm:$0xff] }
 0x109   :  { %v1655_v42 = vadd.f32 %v1555_v46, %v1554_v59  ;;  %v1472_v60 = vadd.f32 %v4963_v12, %v1376_v4  ;;  %v1292_v8 = vmul.f32 %v4943_v23, %v6270_v14  ;;  %v1293_v55 = vmul.f32 %v4943_v23, %v6271_v39 }
 0x10a   :  { %v1473_v34 = vadd.f32 %v4963_v12, %v1377_v45  ;;  %v1016_v36 = vadd.f32 %v936_v21, %v660_v22  ;;  %v1017_v16 = vadd.f32 %v937_v29, %v661_v53  ;;  %v298_v40 = vmul.f32 %v6288_v6, %v6246_v7  ;;  %v6292_v45 = vld [vmem:[#allocation107_spill] sm:$0xff] }
 0x10b   :  { %1656 = vadd.xlane.f32.xlu1 %v1655_v42  ;;  %v1552_v32 = vmax.f32 %v1472_v60, 0.0  ;;  %v299_v27 = vmul.f32 %v6288_v6, %v6247_v31  ;;  %v574_v0 = vmul.f32 %v6290_v54, %v6289_v5  ;;  %v575_v24 = vmul.f32 %v6290_v54, %v6291_v33 }
 0x10c   :  { %v1553_v51 = vmax.f32 %v1473_v34, 0.0  ;;  %v1372_v3 = vadd.f32 %v1292_v8, %v1016_v36  ;;  %v1373_v59 = vadd.f32 %v1293_v55, %v1017_v16  ;;  %v930_v46 = vmul.f32 %v4863_v25, %v6214_v26  ;;  %v6293_v55 = vld [vmem:[#allocation48_spill] sm:$0xff]  ;;  %v6294_v34 = vld [vmem:[#allocation49_spill] sm:$0xff] }
 0x10d   :  { %v654_v4 = vadd.f32 %v574_v0, %v298_v40  ;;  %v655_v21 = vadd.f32 %v575_v24, %v299_v27  ;;  %v931_v7 = vmul.f32 %v4863_v25, %v6216_v19  ;;  %v1286_v31 = vmul.f32 %v6292_v45, %v6250_v28  ;;  %v6295_v28 = vld [vmem:[#allocation50_spill] sm:$0xff]  ;;  %v6296_v40 = vld [vmem:[#allocation73_spill] sm:$0xff]  ;;  %v6297_v27 = vld [vmem:[#allocation51_spill] sm:$0xff] }
 0x10e   :  { %v1652_v22 = vadd.f32 %v1553_v51, %v1552_v32  ;;  %v1468_v53 = vadd.f32 %v4977_v50, %v1372_v3  ;;  %v1469_v29 = vadd.f32 %v4977_v50, %v1373_v59  ;;  %v1287_v42 = vmul.f32 %v6292_v45, %v6255_v37  ;;  %v6298_v37 = vld [vmem:[#allocation58_spill] sm:$0xff]  ;;  %v6299_v51 = vld [vmem:[#allocation59_spill] sm:$0xff] }
 0x10f   :  { %v1010_v60 = vadd.f32 %v930_v46, %v654_v4  ;;  %v1011_v8 = vadd.f32 %v931_v7, %v655_v21  ;;  %v316_v26 = vmul.f32 %v4885_v15, %v6293_v55  ;;  %v317_v36 = vmul.f32 %v4885_v15, %v6294_v34  ;;  %v6300_v21 = vld [vmem:[#allocation60_spill] sm:$0xff] }
 0x110   :  { %1653 = vadd.xlane.f32.xlu0 %v1652_v22  ;;  %v1548_v19 = vmax.f32 %v1468_v53, 0.0  ;;  %v1549_v16 = vmax.f32 %v1469_v29, 0.0  ;;  %v592_v32 = vmul.f32 %v6296_v40, %v6295_v28  ;;  %v593_v5 = vmul.f32 %v6296_v40, %v6297_v27  ;;  %v6301_v29 = vld [vmem:[#allocation61_spill] sm:$0xff] }
 0x111   :  { %v1366_v0 = vadd.f32 %v1286_v31, %v1010_v60  ;;  %v1367_v33 = vadd.f32 %v1287_v42, %v1011_v8  ;;  %v948_v24 = vmul.f32 %v6272_v30, %v6298_v37  ;;  %v949_v3 = vmul.f32 %v6272_v30, %v6299_v51 }
 0x112   :  { %v1646_v59 = vadd.f32 %v1549_v16, %v1548_v19  ;;  %v672_v46 = vadd.f32 %v592_v32, %v316_v26  ;;  %v673_v4 = vadd.f32 %v593_v5, %v317_v36  ;;  %v1304_v7 = vmul.f32 %v6275_v10, %v6300_v21 }
 0x113   :  { %v1462_v22 = vadd.f32 %v4987_v35, %v1366_v0  ;;  %v1463_v53 = vadd.f32 %v4987_v35, %v1367_v33  ;;  %v1305_v31 = vmul.f32 %v6275_v10, %v6301_v29  ;;  %v312_v42 = vmul.f32 %v6286_v9, %v6276_v56 }
 0x114   :  { %1647 = vadd.xlane.f32.xlu1 %v1646_v59  ;;  %v1028_v60 = vadd.f32 %v948_v24, %v672_v46  ;;  %v1029_v8 = vadd.f32 %v949_v3, %v673_v4  ;;  %v313_v26 = vmul.f32 %v6286_v9, %v6277_v11  ;;  %v588_v36 = vmul.f32 %v6287_v44, %v6278_v57  ;;  %v6308_v57 = vld [vmem:[#allocation68_spill] sm:$0xff] }
 0x115   :  { %v1542_v19 = vmax.f32 %v1462_v22, 0.0  ;;  %v1543_v16 = vmax.f32 %v1463_v53, 0.0  ;;  %v589_v32 = vmul.f32 %v6287_v44, %v6279_v43  ;;  %v944_v5 = vmul.f32 %v4829_v18, %v6280_v47  ;;  %v6302_v47 = vld [vmem:[#allocation52_spill] sm:$0xff] }
 0x116   :  { %v1384_v0 = vadd.f32 %v1304_v7, %v1028_v60  ;;  %v1385_v33 = vadd.f32 %v1305_v31, %v1029_v8  ;;  %v668_v56 = vadd.f32 %v588_v36, %v312_v42  ;;  %v945_v24 = vmul.f32 %v4829_v18, %v6281_v38  ;;  %v6303_v42 = vld [vmem:[#allocation53_spill] sm:$0xff]  ;;  %v6304_v8 = vld [vmem:[#allocation56_spill] sm:$0xff] }
 0x117   :  { %v1637_v3 = vadd.f32 %v1543_v16, %v1542_v19  ;;  %v669_v59 = vadd.f32 %v589_v32, %v313_v26  ;;  %v1300_v46 = vmul.f32 %v4943_v23, %v6282_v58  ;;  %v1301_v4 = vmul.f32 %v4943_v23, %v6283_v48  ;;  %v6305_v36 = vld [vmem:[#allocation57_spill] sm:$0xff]  ;;  %v6306_v48 = vld [vmem:[#allocation64_spill] sm:$0xff] }
 0x118   :  { %v1480_v22 = vadd.f32 %v4963_v12, %v1384_v0  ;;  %v1481_v53 = vadd.f32 %v4963_v12, %v1385_v33  ;;  %v1024_v43 = vadd.f32 %v944_v5, %v668_v56  ;;  %v324_v7 = vmul.f32 %v4885_v15, %v6302_v47  ;;  %v6309_v23 = vld [vmem:[#allocation69_spill] sm:$0xff]  ;;  %v6326_v44 = vld [vmem:[#allocation16_spill] sm:$0xff] }
 0x119   :  { %1638 = vadd.xlane.f32.xlu0 %v1637_v3  ;;  %v1025_v31 = vadd.f32 %v945_v24, %v669_v59  ;;  %v325_v60 = vmul.f32 %v4885_v15, %v6303_v42  ;;  %v600_v26 = vmul.f32 %v6296_v40, %v6304_v8  ;;  %v601_v19 = vmul.f32 %v6296_v40, %v6305_v36  ;;  %v6307_v3 = vld [vmem:[#allocation65_spill] sm:$0xff] }
 0x11a   :  { %v1560_v16 = vmax.f32 %v1480_v22, 0.0  ;;  %v1561_v32 = vmax.f32 %v1481_v53, 0.0  ;;  %v1380_v0 = vadd.f32 %v1300_v46, %v1024_v43  ;;  %v956_v56 = vmul.f32 %v6272_v30, %v6306_v48 }
 0x11b   :  { %v1381_v5 = vadd.f32 %v1301_v4, %v1025_v31  ;;  %v680_v33 = vadd.f32 %v600_v26, %v324_v7  ;;  %v681_v58 = vadd.f32 %v601_v19, %v325_v60  ;;  %v957_v24 = vmul.f32 %v6272_v30, %v6307_v3 }
 0x11c   :  { %v1664_v59 = vadd.f32 %v1561_v32, %v1560_v16  ;;  %v1476_v38 = vadd.f32 %v4977_v50, %v1380_v0  ;;  %v1312_v11 = vmul.f32 %v6275_v10, %v6308_v57  ;;  %v1313_v22 = vmul.f32 %v6275_v10, %v6309_v23 }
 0x11d   :  { %v1477_v43 = vadd.f32 %v4977_v50, %v1381_v5  ;;  %v1036_v46 = vadd.f32 %v956_v56, %v680_v33  ;;  %v1037_v53 = vadd.f32 %v957_v24, %v681_v58  ;;  %v318_v4 = vmul.f32 %v4923_v17, %v6293_v55  ;;  %v6312_v50 = vld [vmem:[#allocation62_spill] sm:$0xff] }
 0x11e   :  { %1665 = vadd.xlane.f32.xlu1 %v1664_v59  ;;  %v1556_v7 = vmax.f32 %v1476_v38, 0.0  ;;  %v319_v31 = vmul.f32 %v4923_v17, %v6294_v34  ;;  %v594_v60 = vmul.f32 %v6266_v41, %v6295_v28  ;;  %v595_v26 = vmul.f32 %v6266_v41, %v6297_v27 }
 0x11f   :  { %v1557_v19 = vmax.f32 %v1477_v43, 0.0  ;;  %v1392_v16 = vadd.f32 %v1312_v11, %v1036_v46  ;;  %v1393_v32 = vadd.f32 %v1313_v22, %v1037_v53  ;;  %v950_v58 = vmul.f32 %v6261_v20, %v6298_v37  ;;  %v6310_v46 = vld [vmem:[#allocation54_spill] sm:$0xff] }
 0x120   :  { %v674_v0 = vadd.f32 %v594_v60, %v318_v4  ;;  %v675_v56 = vadd.f32 %v595_v26, %v319_v31  ;;  %v951_v38 = vmul.f32 %v6261_v20, %v6299_v51  ;;  %v1306_v5 = vmul.f32 %v4917_v63, %v6300_v21  ;;  %v6311_v4 = vld [vmem:[#allocation55_spill] sm:$0xff] }
 0x121   :  { %v1658_v33 = vadd.f32 %v1557_v19, %v1556_v7  ;;  %v1488_v24 = vadd.f32 %v4963_v12, %v1392_v16  ;;  %v1489_v59 = vadd.f32 %v4963_v12, %v1393_v32  ;;  %v1307_v11 = vmul.f32 %v4917_v63, %v6301_v29  ;;  %v6313_v19 = vld [vmem:[#allocation63_spill] sm:$0xff]  ;;  %v6314_v29 = vld [vmem:[#allocation74_spill] sm:$0xff] }
 0x122   :  { %v1030_v22 = vadd.f32 %v950_v58, %v674_v0  ;;  %v1031_v43 = vadd.f32 %v951_v38, %v675_v56  ;;  %v332_v53 = vmul.f32 %v4885_v15, %v6310_v46  ;;  %v333_v31 = vmul.f32 %v4885_v15, %v6311_v4  ;;  %v6315_v0 = vld [vmem:[#allocation75_spill] sm:$0xff] }
 0x123   :  { %1659 = vadd.xlane.f32.xlu0 %v1658_v33  ;;  %v1568_v60 = vmax.f32 %v1488_v24, 0.0  ;;  %v1569_v26 = vmax.f32 %v1489_v59, 0.0  ;;  %v608_v7 = vmul.f32 %v6296_v40, %v6312_v50  ;;  %v609_v16 = vmul.f32 %v6296_v40, %v6313_v19  ;;  %v6316_v33 = vld [vmem:[#allocation17_spill] sm:$0xff]  ;;  %v6317_v24 = vld [vmem:[#allocation39_spill] sm:$0xff] }
 0x124   :  { %v1386_v32 = vadd.f32 %v1306_v5, %v1030_v22  ;;  %v1387_v21 = vadd.f32 %v1307_v11, %v1031_v43  ;;  %v964_v58 = vmul.f32 %v6272_v30, %v6314_v29  ;;  %v965_v56 = vmul.f32 %v6272_v30, %v6315_v0  ;;  %v6319_v11 = vld [vmem:[#allocation18_spill] sm:$0xff] }
 0x125   :  { %v1676_v38 = vadd.f32 %v1569_v26, %v1568_v60  ;;  %v688_v51 = vadd.f32 %v608_v7, %v332_v53  ;;  %v689_v18 = vadd.f32 %v609_v16, %v333_v31  ;;  %v6318_v59 = vrot.slane %v6317_v24, %v6316_v33 }
 0x126   :  { %v1482_v27 = vadd.f32 %v6228_v52, %v1386_v32  ;;  %v1483_v5 = vadd.f32 %v6228_v52, %v1387_v21  ;;  %v6320_v22 = vrot.slane %v6317_v24, %v6319_v11  ;;  %v326_v53 = vmul.f32 %v4923_v17, %v6302_v47 }
 0x127   :  { %v5265_v37 = vrot.slane %v6318_v59, %v6316_v33  ;;  %1677 = vadd.xlane.f32.xlu1 %v1676_v38  ;;  %v1044_v31 = vadd.f32 %v964_v58, %v688_v51  ;;  %v1045_v60 = vadd.f32 %v965_v56, %v689_v18  ;;  %v327_v7 = vmul.f32 %v4923_v17, %v6303_v42 }
 0x128   :  { %v5273_v43 = vrot.slane %v6320_v22, %v6316_v33  ;;  %v1562_v16 = vmax.f32 %v1482_v27, 0.0  ;;  %v1563_v21 = vmax.f32 %v1483_v5, 0.0  ;;  %v602_v24 = vmul.f32 %v6266_v41, %v6304_v8 }
 0x129   :  { %v1320_v26 = vmul.f32 %v6275_v10, %v5265_v37  ;;  %v603_v38 = vmul.f32 %v6266_v41, %v6305_v36  ;;  %v958_v18 = vmul.f32 %v6261_v20, %v6306_v48  ;;  %v959_v51 = vmul.f32 %v6261_v20, %v6307_v3  ;;  %v6322_v3 = vld [vmem:[#allocation67_spill] sm:$0xff] }
 0x12a   :  { %v1321_v32 = vmul.f32 %v6275_v10, %v5273_v43  ;;  %v1667_v58 = vadd.f32 %v1563_v21, %v1562_v16  ;;  %v682_v27 = vadd.f32 %v602_v24, %v326_v53  ;;  %v1314_v5 = vmul.f32 %v4917_v63, %v6308_v57  ;;  %v6323_v53 = vld [vmem:[#allocation70_spill] sm:$0xff]  ;;  %v6324_v24 = vld [vmem:[#allocation71_spill] sm:$0xff] }
 0x12b   :  { %v1400_v59 = vadd.f32 %v1320_v26, %v1044_v31  ;;  %v683_v42 = vadd.f32 %v603_v38, %v327_v7  ;;  %v1315_v31 = vmul.f32 %v4917_v63, %v6309_v23  ;;  %v6321_v26 = vld [vmem:[#allocation66_spill] sm:$0xff]  ;;  %v616_v16 = vmul.f32 %v6296_v40, %v6323_v53  ;;  %v6325_v38 = vld [vmem:[#allocation15_spill] sm:$0xff] }
 0x12c   :  { %v1401_v56 = vadd.f32 %v1321_v32, %v1045_v60  ;;  %v340_v36 = vmul.f32 %v4885_v15, %v6321_v26  ;;  %1668 = vadd.xlane.f32.xlu0 %v1667_v58  ;;  %v1038_v8 = vadd.f32 %v958_v18, %v682_v27  ;;  %v341_v60 = vmul.f32 %v4885_v15, %v6322_v3 }
 0x12d   :  { %v1496_v22 = vadd.f32 %v4963_v12, %v1400_v59  ;;  %v1039_v32 = vadd.f32 %v959_v51, %v683_v42  ;;  %v617_v7 = vmul.f32 %v6296_v40, %v6324_v24  ;;  %v4077_v59 = vld [vmem:[#allocation3 + $0x48] sm:$0xff] }
 0x12e   :  { %v1497_v48 = vadd.f32 %v4963_v12, %v1401_v56  ;;  %v779_v23 = vrot.slane %v4077_v59, %v6325_v38  ;;  %v1394_v47 = vadd.f32 %v1314_v5, %v1038_v8  ;;  %v696_v58 = vadd.f32 %v616_v16, %v340_v36 }
 0x12f   :  { %v1576_v21 = vmax.f32 %v1496_v22, 0.0  ;;  %v783_v56 = vrot.slane %v4077_v59, %v6326_v44  ;;  %v1395_v18 = vadd.f32 %v1315_v31, %v1039_v32  ;;  %v697_v27 = vadd.f32 %v617_v7, %v341_v60 }
 0x130   :  { %v1577_v57 = vmax.f32 %v1497_v48, 0.0  ;;  %v5308_v15 = vrot.slane %v779_v23, %v6325_v38  ;;  %v1135_v28 = vrot.slane %v4077_v59, %v6316_v33  ;;  %v1490_v42 = vadd.f32 %v6228_v52, %v1394_v47 }
 0x131   :  { %v5313_v40 = vrot.slane %v783_v56, %v6325_v38  ;;  %v1139_v51 = vrot.slane %v4077_v59, %v6319_v11  ;;  %v1491_v48 = vadd.f32 %v6228_v52, %v1395_v18  ;;  %v334_v23 = vmul.f32 %v4923_v17, %v6310_v46 }
 0x132   :  { %v1688_v22 = vadd.f32 %v1577_v57, %v1576_v21  ;;  %v972_v44 = vmul.f32 %v6272_v30, %v5308_v15  ;;  %v5320_v8 = vrot.slane %v1135_v28, %v6316_v33  ;;  %v1570_v57 = vmax.f32 %v1490_v42, 0.0 }
 0x133   :  { %v973_v47 = vmul.f32 %v6272_v30, %v5313_v40  ;;  %v5327_v36 = vrot.slane %v1139_v51, %v6316_v33  ;;  %v335_v11 = vmul.f32 %v4923_v17, %v6311_v4  ;;  %v1571_v5 = vmax.f32 %v1491_v48, 0.0 }
 0x134   :  { %1689 = vadd.xlane.f32.xlu1 %v1688_v22  ;;  %v1052_v31 = vadd.f32 %v972_v44, %v696_v58  ;;  %v1328_v28 = vmul.f32 %v6275_v10, %v5320_v8  ;;  %v610_v60 = vmul.f32 %v6266_v41, %v6312_v50  ;;  %v611_v30 = vmul.f32 %v6266_v41, %v6313_v19 }
 0x135   :  { %v1053_v16 = vadd.f32 %v973_v47, %v697_v27  ;;  %v1329_v21 = vmul.f32 %v6275_v10, %v5327_v36  ;;  %v966_v33 = vmul.f32 %v6261_v20, %v6314_v29  ;;  %v1679_v32 = vadd.f32 %v1571_v5, %v1570_v57 }
 0x136   :  { %v1408_v7 = vadd.f32 %v1328_v28, %v1052_v31  ;;  %v690_v59 = vadd.f32 %v610_v60, %v334_v23  ;;  %v967_v38 = vmul.f32 %v6261_v20, %v6315_v0  ;;  %v691_v56 = vadd.f32 %v611_v30, %v335_v11 }
 0x137   :  { %v1409_v58 = vadd.f32 %v1329_v21, %v1053_v16  ;;  %v1322_v18 = vmul.f32 %v4917_v63, %v5265_v37  ;;  %v1323_v10 = vmul.f32 %v4917_v63, %v5273_v43  ;;  %1680 = vadd.xlane.f32.xlu0 %v1679_v32  ;;  %v306_v42 = vmul.f32 %v6288_v6, %v6263_v61 }
 0x138   :  { %v1504_v27 = vadd.f32 %v4963_v12, %v1408_v7  ;;  %v1046_v22 = vadd.f32 %v966_v33, %v690_v59  ;;  %v307_v51 = vmul.f32 %v6288_v6, %v6264_v62  ;;  %v1047_v44 = vadd.f32 %v967_v38, %v691_v56 }
 0x139   :  { %v1505_v48 = vadd.f32 %v4963_v12, %v1409_v58  ;;  %v582_v23 = vmul.f32 %v6290_v54, %v6265_v49  ;;  %v583_v57 = vmul.f32 %v6290_v54, %v6267_v13  ;;  %v938_v5 = vmul.f32 %v4863_v25, %v6268_v1 }
 0x13a   :  { %v1584_v47 = vmax.f32 %v1504_v27, 0.0  ;;  %v1402_v11 = vadd.f32 %v1322_v18, %v1046_v22  ;;  %v939_v61 = vmul.f32 %v4863_v25, %v6269_v2  ;;  %v1403_v28 = vadd.f32 %v1323_v10, %v1047_v44 }
 0x13b   :  { %v1585_v31 = vmax.f32 %v1505_v48, 0.0  ;;  %v662_v62 = vadd.f32 %v582_v23, %v306_v42  ;;  %v663_v60 = vadd.f32 %v583_v57, %v307_v51  ;;  %v1294_v49 = vmul.f32 %v6292_v45, %v6270_v14 }
 0x13c   :  { %v1498_v12 = vadd.f32 %v6228_v52, %v1402_v11  ;;  %v1295_v13 = vmul.f32 %v6292_v45, %v6271_v39  ;;  %v342_v16 = vmul.f32 %v4923_v17, %v6321_v26  ;;  %v1499_v1 = vadd.f32 %v6228_v52, %v1403_v28  ;;  %v6328_v11 = vld [vmem:[#allocation98_spill] sm:$0xff] }
 0x13d   :  { %v1700_v21 = vadd.f32 %v1585_v31, %v1584_v47  ;;  %v1018_v30 = vadd.f32 %v938_v5, %v662_v62  ;;  %v1019_v2 = vadd.f32 %v939_v61, %v663_v60  ;;  %v343_v32 = vmul.f32 %v4923_v17, %v6322_v3  ;;  %v6327_v47 = vld [vmem:[#allocation50_spill] sm:$0xff]  ;;  %v6329_v61 = vld [vmem:[#allocation51_spill] sm:$0xff] }
 0x13e   :  { %v1578_v33 = vmax.f32 %v1498_v12, 0.0  ;;  %v618_v7 = vmul.f32 %v6266_v41, %v6323_v53  ;;  %v619_v14 = vmul.f32 %v6266_v41, %v6324_v24  ;;  %v1579_v39 = vmax.f32 %v1499_v1, 0.0  ;;  %v6331_v60 = vld [vmem:[#allocation114_spill] sm:$0xff] }
 0x13f   :  { %1701 = vadd.xlane.f32.xlu1 %v1700_v21  ;;  %v1374_v59 = vadd.f32 %v1294_v49, %v1018_v30  ;;  %v1375_v38 = vadd.f32 %v1295_v13, %v1019_v2  ;;  %v974_v58 = vmul.f32 %v6261_v20, %v5308_v15  ;;  %v975_v10 = vmul.f32 %v6261_v20, %v5313_v40  ;;  %v6332_v49 = vld [vmem:[#allocation59_spill] sm:$0xff]  ;;  %v6333_v30 = vld [vmem:[#allocation60_spill] sm:$0xff]  ;;  %v6334_v2 = vld [vmem:[#allocation118_spill] sm:$0xff] }
 0x140   :  { %v698_v56 = vadd.f32 %v618_v7, %v342_v16  ;;  %v699_v18 = vadd.f32 %v619_v14, %v343_v32  ;;  %v1330_v17 = vmul.f32 %v4917_v63, %v5320_v8  ;;  %v1691_v27 = vadd.f32 %v1579_v39, %v1578_v33  ;;  %v6335_v14 = vld [vmem:[#allocation61_spill] sm:$0xff] }
 0x141   :  { %v1470_v22 = vadd.f32 %v4987_v35, %v1374_v59  ;;  %v1471_v41 = vadd.f32 %v4987_v35, %v1375_v38  ;;  %v1331_v42 = vmul.f32 %v4917_v63, %v5327_v36  ;;  %v320_v44 = vmul.f32 %v6286_v9, %v6293_v55  ;;  %v6330_v63 = vld [vmem:[#allocation58_spill] sm:$0xff]  ;;  %v6336_v59 = vld [vmem:[#allocation35_spill] sm:$0xff] }
 0x142   :  { %v1054_v51 = vadd.f32 %v974_v58, %v698_v56  ;;  %v1055_v48 = vadd.f32 %v975_v10, %v699_v18  ;;  %v321_v23 = vmul.f32 %v6286_v9, %v6294_v34  ;;  %1692 = vadd.xlane.f32.xlu0 %v1691_v27  ;;  %v596_v5 = vmul.f32 %v6328_v11, %v6327_v47  ;;  %v6337_v18 = vld [vmem:[#allocation36_spill] sm:$0xff] }
 0x143   :  { %v1550_v20 = vmax.f32 %v1470_v22, 0.0  ;;  %v1551_v57 = vmax.f32 %v1471_v41, 0.0  ;;  %v597_v31 = vmul.f32 %v6328_v11, %v6329_v61  ;;  %v952_v12 = vmul.f32 %v6331_v60, %v6330_v63 }
 0x144   :  { %v1410_v28 = vadd.f32 %v1330_v17, %v1054_v51  ;;  %v1411_v62 = vadd.f32 %v1331_v42, %v1055_v48  ;;  %v953_v13 = vmul.f32 %v6331_v60, %v6332_v49  ;;  %v676_v21 = vadd.f32 %v596_v5, %v320_v44  ;;  %v6338_v17 = vld [vmem:[#allocation37_spill] sm:$0xff]  ;;  %v6339_v42 = vld [vmem:[#allocation38_spill] sm:$0xff]  ;;  %v6340_v51 = vld [vmem:[#allocation44_spill] sm:$0xff] }
 0x145   :  { %v1649_v16 = vadd.f32 %v1551_v57, %v1550_v20  ;;  %v677_v1 = vadd.f32 %v597_v31, %v321_v23  ;;  %v1308_v33 = vmul.f32 %v6334_v2, %v6333_v30  ;;  %v1309_v39 = vmul.f32 %v6334_v2, %v6335_v14  ;;  %v6341_v57 = vld [vmem:[#allocation45_spill] sm:$0xff] }
 0x146   :  { %v1506_v32 = vadd.f32 %v6228_v52, %v1410_v28  ;;  %v1507_v7 = vadd.f32 %v6228_v52, %v1411_v62  ;;  %v314_v38 = vmul.f32 %v6288_v6, %v6336_v59  ;;  %v1032_v58 = vadd.f32 %v952_v12, %v676_v21  ;;  %v6342_v62 = vld [vmem:[#allocation46_spill] sm:$0xff]  ;;  %v6344_v21 = vld [vmem:[#allocation19_spill] sm:$0xff] }
 0x147   :  { %1650 = vadd.xlane.f32.xlu1 %v1649_v16  ;;  %v1033_v56 = vadd.f32 %v953_v13, %v677_v1  ;;  %v315_v10 = vmul.f32 %v6288_v6, %v6337_v18  ;;  %v590_v27 = vmul.f32 %v6290_v54, %v6338_v17  ;;  %v591_v52 = vmul.f32 %v6290_v54, %v6339_v42  ;;  %v6343_v13 = vld [vmem:[#allocation47_spill] sm:$0xff] }
 0x148   :  { %v1586_v22 = vmax.f32 %v1506_v32, 0.0  ;;  %v1587_v41 = vmax.f32 %v1507_v7, 0.0  ;;  %v946_v48 = vmul.f32 %v4863_v25, %v6340_v51  ;;  %v1388_v44 = vadd.f32 %v1308_v33, %v1032_v58 }
 0x149   :  { %v1389_v23 = vadd.f32 %v1309_v39, %v1033_v56  ;;  %v670_v20 = vadd.f32 %v590_v27, %v314_v38  ;;  %v947_v5 = vmul.f32 %v4863_v25, %v6341_v57  ;;  %v671_v28 = vadd.f32 %v591_v52, %v315_v10 }
 0x14a   :  { %v1703_v31 = vadd.f32 %v1587_v41, %v1586_v22  ;;  %v1302_v12 = vmul.f32 %v6292_v45, %v6342_v62  ;;  %v1303_v16 = vmul.f32 %v6292_v45, %v6343_v13  ;;  %v1484_v1 = vadd.f32 %v6344_v21, %v1388_v44  ;;  %v6346_v62 = vld [vmem:[#allocation53_spill] sm:$0xff]  ;;  %v6347_v13 = vld [vmem:[#allocation56_spill] sm:$0xff] }
 0x14b   :  { %v1485_v32 = vadd.f32 %v6344_v21, %v1389_v23  ;;  %v1026_v7 = vadd.f32 %v946_v48, %v670_v20  ;;  %v336_v33 = vmul.f32 %v6286_v9, %v6310_v46  ;;  %v1027_v39 = vadd.f32 %v947_v5, %v671_v28  ;;  %v6345_v5 = vld [vmem:[#allocation52_spill] sm:$0xff] }
 0x14c   :  { %1704 = vadd.xlane.f32.xlu0 %v1703_v31  ;;  %v337_v59 = vmul.f32 %v6286_v9, %v6311_v4  ;;  %v612_v38 = vmul.f32 %v6328_v11, %v6312_v50  ;;  %v613_v58 = vmul.f32 %v6328_v11, %v6313_v19  ;;  %v1564_v56 = vmax.f32 %v1484_v1, 0.0  ;;  %v6348_v1 = vld [vmem:[#allocation57_spill] sm:$0xff] }
 0x14d   :  { %v1565_v18 = vmax.f32 %v1485_v32, 0.0  ;;  %v1382_v10 = vadd.f32 %v1302_v12, %v1026_v7  ;;  %v968_v17 = vmul.f32 %v6331_v60, %v6314_v29  ;;  %v1383_v27 = vadd.f32 %v1303_v16, %v1027_v39 }
 0x14e   :  { %v692_v22 = vadd.f32 %v612_v38, %v336_v33  ;;  %v693_v41 = vadd.f32 %v613_v58, %v337_v59  ;;  %v969_v42 = vmul.f32 %v6331_v60, %v6315_v0  ;;  %v1324_v48 = vmul.f32 %v6334_v2, %v5265_v37  ;;  %v6349_v59 = vld [vmem:[#allocation64_spill] sm:$0xff] }
 0x14f   :  { %v1670_v52 = vadd.f32 %v1565_v18, %v1564_v56  ;;  %v1478_v51 = vadd.f32 %v4987_v35, %v1382_v10  ;;  %v1325_v44 = vmul.f32 %v6334_v2, %v5273_v43  ;;  %v1479_v23 = vadd.f32 %v4987_v35, %v1383_v27  ;;  %v6350_v18 = vld [vmem:[#allocation65_spill] sm:$0xff] }
 0x150   :  { %v1048_v20 = vadd.f32 %v968_v17, %v692_v22  ;;  %v1049_v57 = vadd.f32 %v969_v42, %v693_v41  ;;  %v328_v31 = vmul.f32 %v6286_v9, %v6345_v5  ;;  %v329_v12 = vmul.f32 %v6286_v9, %v6346_v62  ;;  %v6351_v17 = vld [vmem:[#allocation68_spill] sm:$0xff] }
 0x151   :  { %1671 = vadd.xlane.f32.xlu1 %v1670_v52  ;;  %v1558_v28 = vmax.f32 %v1478_v51, 0.0  ;;  %v604_v16 = vmul.f32 %v6328_v11, %v6347_v13  ;;  %v605_v32 = vmul.f32 %v6328_v11, %v6348_v1  ;;  %v1559_v7 = vmax.f32 %v1479_v23, 0.0  ;;  %v6352_v52 = vld [vmem:[#allocation69_spill] sm:$0xff] }
 0x152   :  { %v1404_v33 = vadd.f32 %v1324_v48, %v1048_v20  ;;  %v1405_v39 = vadd.f32 %v1325_v44, %v1049_v57  ;;  %v960_v38 = vmul.f32 %v6331_v60, %v6349_v59  ;;  %v961_v10 = vmul.f32 %v6331_v60, %v6350_v18 }
 0x153   :  { %v684_v58 = vadd.f32 %v604_v16, %v328_v31  ;;  %v685_v56 = vadd.f32 %v605_v32, %v329_v12  ;;  %v1316_v27 = vmul.f32 %v6334_v2, %v6351_v17  ;;  %v1661_v22 = vadd.f32 %v1559_v7, %v1558_v28 }
 0x154   :  { %v1500_v41 = vadd.f32 %v6344_v21, %v1404_v33  ;;  %v1501_v42 = vadd.f32 %v6344_v21, %v1405_v39  ;;  %v1317_v51 = vmul.f32 %v6334_v2, %v6352_v52  ;;  %v322_v23 = vmul.f32 %v6288_v6, %v6293_v55 }
 0x155   :  { %v1040_v48 = vadd.f32 %v960_v38, %v684_v58  ;;  %v1041_v44 = vadd.f32 %v961_v10, %v685_v56  ;;  %v323_v20 = vmul.f32 %v6288_v6, %v6294_v34  ;;  %1662 = vadd.xlane.f32.xlu0 %v1661_v22  ;;  %v598_v28 = vmul.f32 %v6290_v54, %v6327_v47 }
 0x156   :  { %v1580_v57 = vmax.f32 %v1500_v41, 0.0  ;;  %v1581_v31 = vmax.f32 %v1501_v42, 0.0  ;;  %v599_v12 = vmul.f32 %v6290_v54, %v6329_v61  ;;  %v954_v7 = vmul.f32 %v4863_v25, %v6330_v63 }
 0x157   :  { %v1396_v16 = vadd.f32 %v1316_v27, %v1040_v48  ;;  %v1397_v32 = vadd.f32 %v1317_v51, %v1041_v44  ;;  %v955_v55 = vmul.f32 %v4863_v25, %v6332_v49  ;;  %v678_v39 = vadd.f32 %v598_v28, %v322_v23 }
 0x158   :  { %v1694_v33 = vadd.f32 %v1581_v31, %v1580_v57  ;;  %v679_v34 = vadd.f32 %v599_v12, %v323_v20  ;;  %v1310_v38 = vmul.f32 %v6292_v45, %v6333_v30  ;;  %v1311_v61 = vmul.f32 %v6292_v45, %v6335_v14 }
 0x159   :  { %v1492_v58 = vadd.f32 %v6344_v21, %v1396_v16  ;;  %v1493_v47 = vadd.f32 %v6344_v21, %v1397_v32  ;;  %v344_v56 = vmul.f32 %v6286_v9, %v6321_v26  ;;  %v1034_v63 = vadd.f32 %v954_v7, %v678_v39 }
 0x15a   :  { %1695 = vadd.xlane.f32.xlu1 %v1694_v33  ;;  %v1035_v10 = vadd.f32 %v955_v55, %v679_v34  ;;  %v345_v49 = vmul.f32 %v6286_v9, %v6322_v3  ;;  %v620_v27 = vmul.f32 %v6328_v11, %v6323_v53  ;;  %v621_v41 = vmul.f32 %v6328_v11, %v6324_v24 }
 0x15b   :  { %v1572_v30 = vmax.f32 %v1492_v58, 0.0  ;;  %v1573_v22 = vmax.f32 %v1493_v47, 0.0  ;;  %v976_v14 = vmul.f32 %v6331_v60, %v5308_v15  ;;  %v1390_v42 = vadd.f32 %v1310_v38, %v1034_v63 }
 0x15c   :  { %v1391_v51 = vadd.f32 %v1311_v61, %v1035_v10  ;;  %v700_v48 = vadd.f32 %v620_v27, %v344_v56  ;;  %v977_v44 = vmul.f32 %v6331_v60, %v5313_v40  ;;  %v701_v20 = vadd.f32 %v621_v41, %v345_v49 }
 0x15d   :  { %v1682_v23 = vadd.f32 %v1573_v22, %v1572_v30  ;;  %v1332_v9 = vmul.f32 %v6334_v2, %v5320_v8  ;;  %v1333_v57 = vmul.f32 %v6334_v2, %v5327_v36  ;;  %v1486_v31 = vadd.f32 %v4987_v35, %v1390_v42 }
 0x15e   :  { %v1487_v11 = vadd.f32 %v4987_v35, %v1391_v51  ;;  %v1056_v28 = vadd.f32 %v976_v14, %v700_v48  ;;  %v338_v12 = vmul.f32 %v6288_v6, %v6310_v46  ;;  %v1057_v16 = vadd.f32 %v977_v44, %v701_v20 }
 0x15f   :  { %1683 = vadd.xlane.f32.xlu0 %v1682_v23  ;;  %v339_v60 = vmul.f32 %v6288_v6, %v6311_v4  ;;  %v614_v32 = vmul.f32 %v6290_v54, %v6312_v50  ;;  %v615_v7 = vmul.f32 %v6290_v54, %v6313_v19  ;;  %v1566_v2 = vmax.f32 %v1486_v31, 0.0 }
 0x160   :  { %v1567_v55 = vmax.f32 %v1487_v11, 0.0  ;;  %v1412_v33 = vadd.f32 %v1332_v9, %v1056_v28  ;;  %v970_v39 = vmul.f32 %v4863_v25, %v6314_v29  ;;  %v1413_v34 = vadd.f32 %v1333_v57, %v1057_v16 }
 0x161   :  { %v694_v38 = vadd.f32 %v614_v32, %v338_v12  ;;  %v695_v46 = vadd.f32 %v615_v7, %v339_v60  ;;  %v971_v58 = vmul.f32 %v4863_v25, %v6315_v0  ;;  %v1326_v50 = vmul.f32 %v6292_v45, %v5265_v37 }
 0x162   :  { %v1673_v47 = vadd.f32 %v1567_v55, %v1566_v2  ;;  %v1508_v4 = vadd.f32 %v6344_v21, %v1412_v33  ;;  %v1327_v19 = vmul.f32 %v6292_v45, %v5273_v43  ;;  %v1509_v61 = vadd.f32 %v6344_v21, %v1413_v34 }
 0x163   :  { %v1050_v56 = vadd.f32 %v970_v39, %v694_v38  ;;  %v1051_v63 = vadd.f32 %v971_v58, %v695_v46  ;;  %v330_v29 = vmul.f32 %v6288_v6, %v6345_v5  ;;  %v331_v0 = vmul.f32 %v6288_v6, %v6346_v62 }
 0x164   :  { %1674 = vadd.xlane.f32.xlu1 %v1673_v47  ;;  %v1588_v10 = vmax.f32 %v1508_v4, 0.0  ;;  %v606_v49 = vmul.f32 %v6290_v54, %v6347_v13  ;;  %v607_v37 = vmul.f32 %v6290_v54, %v6348_v1  ;;  %v1589_v27 = vmax.f32 %v1509_v61, 0.0 }
 0x165   :  { %v1406_v43 = vadd.f32 %v1326_v50, %v1050_v56  ;;  %v1407_v30 = vadd.f32 %v1327_v19, %v1051_v63  ;;  %v962_v21 = vmul.f32 %v4863_v25, %v6349_v59  ;;  %v963_v5 = vmul.f32 %v4863_v25, %v6350_v18 }
 0x166   :  { %v686_v22 = vadd.f32 %v606_v49, %v330_v29  ;;  %v687_v41 = vadd.f32 %v607_v37, %v331_v0  ;;  %v1318_v62 = vmul.f32 %v6292_v45, %v6351_v17  ;;  %v1706_v14 = vadd.f32 %v1589_v27, %v1588_v10  ;;  %v6353_v10 = vld [vmem:[#allocation12_spill] sm:$0xff] }
 0x167   :  { %v1502_v13 = vadd.f32 %v4987_v35, %v1406_v43  ;;  %v1503_v42 = vadd.f32 %v4987_v35, %v1407_v30  ;;  %v1319_v1 = vmul.f32 %v6292_v45, %v6352_v52  ;;  %v346_v59 = vmul.f32 %v6288_v6, %v6321_v26 }
 0x168   :  { %v1042_v51 = vadd.f32 %v962_v21, %v686_v22  ;;  %v1043_v48 = vadd.f32 %v963_v5, %v687_v41  ;;  %v347_v44 = vmul.f32 %v6288_v6, %v6322_v3  ;;  %1707 = vadd.xlane.f32.xlu0 %v1706_v14  ;;  %v622_v17 = vmul.f32 %v6290_v54, %v6323_v53 }
 0x169   :  { %v1582_v18 = vmax.f32 %v1502_v13, 0.0  ;;  %v1583_v23 = vmax.f32 %v1503_v42, 0.0  ;;  %v623_v20 = vmul.f32 %v6290_v54, %v6324_v24  ;;  %v978_v52 = vmul.f32 %v4863_v25, %v5308_v15  ;;  %v1594_v11 = vpop.xlane.xlu0 %1593 }
 0x16a   :  { %v1398_v9 = vadd.f32 %v1318_v62, %v1042_v51  ;;  %v1399_v57 = vadd.f32 %v1319_v1, %v1043_v48  ;;  %v979_v26 = vmul.f32 %v4863_v25, %v5313_v40  ;;  %v1597_v31 = vpop.xlane.xlu1 %1596  ;;  %v702_v3 = vadd.f32 %v622_v17, %v346_v59 }
 0x16b   :  { %v1697_v6 = vadd.f32 %v1583_v23, %v1582_v18  ;;  %v703_v28 = vadd.f32 %v623_v20, %v347_v44  ;;  %v1334_v12 = vmul.f32 %v6292_v45, %v5320_v8  ;;  %v1335_v24 = vmul.f32 %v6292_v45, %v5327_v36 }
 0x16c   :  { %v1494_v53 = vadd.f32 %v4987_v35, %v1398_v9  ;;  %v1495_v54 = vadd.f32 %v4987_v35, %v1399_v57  ;;  %v4161_v16 = vmov 269488144   ;;  %v1058_v60 = vadd.f32 %v978_v52, %v702_v3 }
 0x16d   :  { %v1762_v15 = vunpack.c.l.s4 %v4161_v16  ;;  %1698 = vadd.xlane.f32.xlu1 %v1697_v6  ;;  %v1059_v25 = vadd.f32 %v979_v26, %v703_v28  ;;  %v4162_v7 = vmov 842150450   ;;  %v1600_v33 = vpop.xlane.xlu0 %1599  ;;  %v4163_v34 = vmov 1414812756  }
 0x16e   :  { %v1574_v40 = vmax.f32 %v1494_v53, 0.0  ;;  %v1575_v32 = vmax.f32 %v1495_v54, 0.0  ;;  %v1769_v2 = vunpack.c.l.s4 %v4162_v7  ;;  %v1606_v55 = vpop.xlane.xlu1 %1605  ;;  %v1414_v39 = vadd.f32 %v1334_v12, %v1058_v60 }
 0x16f   :  { %v1415_v8 = vadd.f32 %v1335_v24, %v1059_v25  ;;  %v1776_v38 = vunpack.c.l.s4 %v4163_v34  ;;  %v1763_v58 = vunpack.c.0.s8 %v1762_v15  ;;  %v4164_v4 = vmov 1987475062  }
 0x170   :  { %v1685_v46 = vadd.f32 %v1575_v32, %v1574_v40  ;;  %v1770_v47 = vunpack.c.0.s8 %v1769_v2  ;;  %v1783_v45 = vunpack.c.l.s4 %v4164_v4  ;;  %v1510_v36 = vadd.f32 %v4987_v35, %v1414_v39 }
 0x171   :  { %v1511_v50 = vadd.f32 %v4987_v35, %v1415_v8  ;;  %v1777_v19 = vunpack.c.0.s8 %v1776_v38  ;;  %v1603_v56 = vpop.xlane.xlu0 %1602  ;;  %v5550_v0 = vsub.s32 %v1763_v58, %v6353_v10  ;;  %v1713_v37 = vmul.f32 0.00390625, %v1597_v31 }
 0x172   :  { %1686 = vadd.xlane.f32.xlu0 %v1685_v46  ;;  %v1784_v61 = vunpack.c.0.s8 %v1783_v45  ;;  %v1590_v63 = vmax.f32 %v1510_v36, 0.0  ;;  %v5553_v49 = vsub.s32 %v1770_v47, %v6353_v10  ;;  %v1612_v27 = vpop.xlane.xlu1 %1611  ;;  %v1712_v21 = vmul.f32 0.00390625, %v1594_v11 }
 0x173   :  { %v1591_v29 = vmax.f32 %v1511_v50, 0.0  ;;  %v5556_v30 = vsub.s32 %v1777_v19, %v6353_v10  ;;  %v1716_v22 = vmul.f32 0.00390625, %v1606_v55  ;;  %v1795_v5 = vrot.slane %v1713_v37, %v5550_v0 }
 0x174   :  { %v5559_v35 = vsub.s32 %v1784_v61, %v6353_v10  ;;  %v1802_v62 = vrot.slane %v1713_v37, %v5553_v49  ;;  %v1767_v13 = vrot.slane %v1712_v21, %v5550_v0  ;;  %v1774_v42 = vrot.slane %v1712_v21, %v5553_v49 }
 0x175   :  { %v1709_v43 = vadd.f32 %v1591_v29, %v1590_v63  ;;  %v1609_v41 = vpop.xlane.xlu0 %1608  ;;  %v1809_v14 = vrot.slane %v1713_v37, %v5556_v30  ;;  %v1781_v51 = vrot.slane %v1712_v21, %v5556_v30  ;;  %v1879_v59 = vrot.slane %v1716_v22, %v5550_v0 }
 0x176   :  { %v1816_v1 = vrot.slane %v1713_v37, %v5559_v35  ;;  %v1788_v48 = vrot.slane %v1712_v21, %v5559_v35  ;;  %v1618_v44 = vpop.xlane.xlu1 %1617  ;;  %v1886_v18 = vrot.slane %v1716_v22, %v5553_v49  ;;  %v1893_v23 = vrot.slane %v1716_v22, %v5556_v30 }
 0x177   :  { %1710 = vadd.xlane.f32.xlu0 %v1709_v43  ;;  %v1900_v17 = vrot.slane %v1716_v22, %v5559_v35  ;;  %v5573_v20 = vmul.f32 0.00390625, %v1600_v33  ;;  %v1715_v9 = vmul.f32 0.00390625, %v1603_v56  ;;  %v4165_v57 = vmov 1983009808  }
 0x178   :  { %v1988_v52 = vunpack.c.l.s4 %v4165_v57  ;;  %v5575_v31 = vmul.f32 0.00390625, %v1612_v27  ;;  %v1717_v11 = vmul.f32 0.00390625, %v1609_v41  ;;  %v2002_v3 = vcombine.low %v1795_v5, %v1802_v62 }
 0x179   :  { %v1615_v26 = vpop.xlane.xlu0 %1614  ;;  %v1985_v28 = vcombine.low %v1767_v13, %v1774_v42  ;;  %v1986_v12 = vcombine.low %v1781_v51, %v1788_v48  ;;  %v1823_v53 = vrot.slane %v5573_v20, %v5550_v0  ;;  %v2003_v54 = vcombine.low %v1809_v14, %v1816_v1 }
 0x17a   :  { %v1989_v6 = vunpack.c.0.s8 %v1988_v52  ;;  %v2053_v24 = vcombine.low %v1879_v59, %v1886_v18  ;;  %v2054_v16 = vcombine.low %v1893_v23, %v1900_v17  ;;  %v1830_v15 = vrot.slane %v5573_v20, %v5553_v49  ;;  %v1624_v32 = vpop.xlane.xlu1 %1623 }
 0x17b   :  { %v1851_v60 = vrot.slane %v1715_v9, %v5550_v0  ;;  %v1858_v25 = vrot.slane %v1715_v9, %v5553_v49  ;;  %v1865_v7 = vrot.slane %v1715_v9, %v5556_v30  ;;  %v1872_v2 = vrot.slane %v1715_v9, %v5559_v35 }
 0x17c   :  { %v5584_v40 = vsub.s32 %v1989_v6, %v6353_v10  ;;  %v1907_v55 = vrot.slane %v1717_v11, %v5550_v0  ;;  %v1914_v33 = vrot.slane %v1717_v11, %v5553_v49  ;;  %v1921_v34 = vrot.slane %v1717_v11, %v5556_v30 }
 0x17d   :  { %v1928_v38 = vrot.slane %v1717_v11, %v5559_v35  ;;  %v1837_v58 = vrot.slane %v5573_v20, %v5556_v30  ;;  %v1722_v45 = vmul.f32 0.00390625, %v1624_v32  ;;  %v1844_v36 = vrot.slane %v5573_v20, %v5559_v35 }
 0x17e   :  { %v1993_v39 = vrot.slane %v1985_v28, %v5584_v40  ;;  %v2000_v8 = vrot.slane %v1986_v12, %v5584_v40  ;;  %v2061_v47 = vrot.slane %v2053_v24, %v5584_v40  ;;  %v2068_v4 = vrot.slane %v2054_v16, %v5584_v40 }
 0x17f   :  { %v1621_v46 = vpop.xlane.xlu0 %1620  ;;  %v2010_v50 = vrot.slane %v2002_v3, %v5584_v40  ;;  %v2017_v19 = vrot.slane %v2003_v54, %v5584_v40  ;;  %v1935_v56 = vrot.slane %v5575_v31, %v5550_v0  ;;  %v2036_v63 = vcombine.low %v1851_v60, %v1858_v25 }
 0x180   :  { %v2001_v61 = vcombine.low %v1993_v39, %v2000_v8  ;;  %v2037_v29 = vcombine.low %v1865_v7, %v1872_v2  ;;  %v2070_v37 = vcombine.low %v1907_v55, %v1914_v33  ;;  %v1942_v27 = vrot.slane %v5575_v31, %v5553_v49 }
 0x181   :  { %v1720_v43 = vmul.f32 0.00390625, %v1618_v44  ;;  %v2069_v21 = vcombine.low %v2061_v47, %v2068_v4  ;;  %v2071_v22 = vcombine.low %v1921_v34, %v1928_v38  ;;  %v1949_v41 = vrot.slane %v5575_v31, %v5556_v30 }
 0x182   :  { %2122 = vperm.xlu1 %4076, %v2001_v61   ;;  %v1956_v5 = vrot.slane %v5575_v31, %v5559_v35  ;;  %v2273_v62 = vrot.slane %v1722_v45, %v5550_v0  ;;  %v5611_v14 = vmul.f32 0.00390625, %v1615_v26  ;;  %v2018_v13 = vcombine.low %v2010_v50, %v2017_v19 }
 0x183   :  { %v2280_v42 = vrot.slane %v1722_v45, %v5553_v49  ;;  %v2287_v1 = vrot.slane %v1722_v45, %v5556_v30  ;;  %v2294_v51 = vrot.slane %v1722_v45, %v5559_v35  ;;  %v1627_v48 = vpop.xlane.xlu0 %1626  ;;  %v2044_v59 = vrot.slane %v2036_v63, %v5584_v40 }
 0x184   :  { %v2051_v44 = vrot.slane %v2037_v29, %v5584_v40  ;;  %v2078_v18 = vrot.slane %v2070_v37, %v5584_v40  ;;  %v2085_v23 = vrot.slane %v2071_v22, %v5584_v40  ;;  %v2217_v17 = vrot.slane %v1720_v43, %v5550_v0  ;;  %v1630_v9 = vpop.xlane.xlu1 %1629 }
 0x185   :  { %v2224_v20 = vrot.slane %v1720_v43, %v5553_v49  ;;  %v2231_v57 = vrot.slane %v1720_v43, %v5556_v30  ;;  %v2238_v52 = vrot.slane %v1720_v43, %v5559_v35  ;;  %v1721_v26 = vmul.f32 0.00390625, %v1621_v46 }
 0x186   :  { %2134 = vperm.xlu1 %4076, %v2069_v21   ;;  %v2086_v31 = vcombine.low %v2078_v18, %v2085_v23  ;;  %v1963_v11 = vrot.slane %v5611_v14, %v5550_v0  ;;  %v2469_v6 = vcombine.low %v2273_v62, %v2280_v42  ;;  %v2470_v3 = vcombine.low %v2287_v1, %v2294_v51 }
 0x187   :  { %v2019_v28 = vcombine.low %v1823_v53, %v1830_v15  ;;  %v2052_v12 = vcombine.low %v2044_v59, %v2051_v44  ;;  %v2020_v54 = vcombine.low %v1837_v58, %v1844_v36  ;;  %v2087_v24 = vcombine.low %v1935_v56, %v1942_v27 }
 0x188   :  { %v2088_v16 = vcombine.low %v1949_v41, %v1956_v5  ;;  %v1724_v60 = vmul.f32 0.00390625, %v1630_v9  ;;  %v2477_v25 = vrot.slane %v2469_v6, %v5584_v40  ;;  %v2484_v32 = vrot.slane %v2470_v3, %v5584_v40  ;;  %v1636_v34 = vpop.xlane.xlu1 %1635 }
 0x189   :  { %v2027_v7 = vrot.slane %v2019_v28, %v5584_v40  ;;  %v2245_v55 = vrot.slane %v1721_v26, %v5550_v0  ;;  %v2252_v33 = vrot.slane %v1721_v26, %v5553_v49  ;;  %v5631_v39 = vmul.f32 0.00390625, %v1627_v48 }
 0x18a   :  { %2137 = vperm.xlu1 %4076, %v2086_v31   ;;  %v2034_v53 = vrot.slane %v2020_v54, %v5584_v40  ;;  %v2259_v15 = vrot.slane %v1721_v26, %v5556_v30  ;;  %v2266_v8 = vrot.slane %v1721_v26, %v5559_v35  ;;  %v2485_v38 = vcombine.low %v2477_v25, %v2484_v32 }
 0x18b   :  { %v1633_v2 = vpop.xlane.xlu0 %1632  ;;  %v2435_v46 = vcombine.low %v2217_v17, %v2224_v20  ;;  %v2095_v47 = vrot.slane %v2087_v24, %v5584_v40  ;;  %v2102_v4 = vrot.slane %v2088_v16, %v5584_v40  ;;  %v2436_v45 = vcombine.low %v2231_v57, %v2238_v52 }
 0x18c   :  { %v2035_v58 = vcombine.low %v2027_v7, %v2034_v53  ;;  %v1970_v36 = vrot.slane %v5611_v14, %v5553_v49  ;;  %v1977_v50 = vrot.slane %v5611_v14, %v5556_v30  ;;  %v1984_v19 = vrot.slane %v5611_v14, %v5559_v35 }
 0x18d   :  { %2125 = vperm.xlu0 %4075, %v2018_v13   ;;  %v1725_v61 = vmul.f32 0.00390625, %v1633_v2  ;;  %v2329_v56 = vrot.slane %v1724_v60, %v5550_v0  ;;  %v2336_v63 = vrot.slane %v1724_v60, %v5553_v49  ;;  %v2343_v29 = vrot.slane %v1724_v60, %v5556_v30 }
 0x18e   :  { %v2350_v37 = vrot.slane %v1724_v60, %v5559_v35  ;;  %2128 = vperm.xlu1 %4076, %v2035_v58   ;;  %v5648_v27 = vmul.f32 0.00390625, %v1636_v34  ;;  %v2301_v43 = vrot.slane %v5631_v39, %v5550_v0  ;;  %v2443_v22 = vrot.slane %v2435_v46, %v5584_v40 }
 0x18f   :  { %v2452_v41 = vcombine.low %v2245_v55, %v2252_v33  ;;  %v2103_v5 = vcombine.low %v2095_v47, %v2102_v4  ;;  %v2450_v13 = vrot.slane %v2436_v45, %v5584_v40  ;;  %v2453_v42 = vcombine.low %v2259_v15, %v2266_v8 }
 0x190   :  { %v1645_v1 = vpop.xlane.xlu1 %1644  ;;  %v2357_v51 = vrot.slane %v1725_v61, %v5550_v0  ;;  %v2364_v48 = vrot.slane %v1725_v61, %v5553_v49  ;;  %v2371_v59 = vrot.slane %v1725_v61, %v5556_v30  ;;  %v2378_v44 = vrot.slane %v1725_v61, %v5559_v35 }
 0x191   :  { %2131 = vperm.xlu0 %4075, %v2052_v12   ;;  %v2308_v9 = vrot.slane %v5631_v39, %v5553_v49  ;;  %v2460_v57 = vrot.slane %v2452_v41, %v5584_v40  ;;  %v2503_v52 = vcombine.low %v2329_v56, %v2336_v63  ;;  %v2504_v26 = vcombine.low %v2343_v29, %v2350_v37 }
 0x192   :  { %2140 = vperm.xlu1 %4076, %v2103_v5   ;;  %v2451_v31 = vcombine.low %v2443_v22, %v2450_v13  ;;  %v2467_v6 = vrot.slane %v2453_v42, %v5584_v40  ;;  %v2315_v12 = vrot.slane %v5631_v39, %v5556_v30  ;;  %v5668_v54 = vmul.f32 0.00390625, %v1645_v1 }
 0x193   :  { %v1642_v21 = vpop.xlane.xlu0 %1641  ;;  %v2520_v24 = vcombine.low %v2357_v51, %v2364_v48  ;;  %v2521_v16 = vcombine.low %v2371_v59, %v2378_v44  ;;  %v2385_v60 = vrot.slane %v5648_v27, %v5550_v0  ;;  %v2322_v25 = vrot.slane %v5631_v39, %v5559_v35 }
 0x194   :  { %v1728_v62 = vmul.f32 0.00390625, %v1642_v21  ;;  %v2392_v2 = vrot.slane %v5648_v27, %v5553_v49  ;;  %v2511_v33 = vrot.slane %v2503_v52, %v5584_v40  ;;  %v2518_v53 = vrot.slane %v2504_v26, %v5584_v40 }
 0x195   :  { %2578 = vperm.xlu0 %4075, %v2485_v38   ;;  %v2104_v15 = vcombine.low %v1963_v11, %v1970_v36  ;;  %v2399_v39 = vrot.slane %v5648_v27, %v5556_v30  ;;  %v2406_v8 = vrot.slane %v5648_v27, %v5559_v35  ;;  %v2468_v34 = vcombine.low %v2460_v57, %v2467_v6 }
 0x196   :  { %v2665_v18 = vrot.slane %v1728_v62, %v5550_v0  ;;  %v2672_v23 = vrot.slane %v1728_v62, %v5553_v49  ;;  %v2679_v17 = vrot.slane %v1728_v62, %v5556_v30  ;;  %v2686_v20 = vrot.slane %v1728_v62, %v5559_v35  ;;  %2572 = vperm.xlu1 %4076, %v2451_v31  }
 0x197   :  { %v2693_v46 = vrot.slane %v5668_v54, %v5550_v0  ;;  %v2528_v47 = vrot.slane %v2520_v24, %v5584_v40  ;;  %v2535_v4 = vrot.slane %v2521_v16, %v5584_v40  ;;  %v2105_v45 = vcombine.low %v1977_v50, %v1984_v19 }
 0x198   :  { %v2883_v3 = vcombine.low %v2665_v18, %v2672_v23  ;;  %v2884_v28 = vcombine.low %v2679_v17, %v2686_v20  ;;  %v1657_v55 = vpop.xlane.xlu1 %1656  ;;  %v2700_v14 = vrot.slane %v5668_v54, %v5553_v49  ;;  %v2707_v11 = vrot.slane %v5668_v54, %v5556_v30 }
 0x199   :  { %v2714_v36 = vrot.slane %v5668_v54, %v5559_v35  ;;  %v1733_v56 = vmul.f32 0.00390625, %v1657_v55  ;;  %v2519_v63 = vcombine.low %v2511_v33, %v2518_v53  ;;  %v2112_v29 = vrot.slane %v2104_v15, %v5584_v40 }
 0x19a   :  { %v2891_v32 = vrot.slane %v2883_v3, %v5584_v40  ;;  %v2898_v7 = vrot.slane %v2884_v28, %v5584_v40  ;;  %2575 = vperm.xlu1 %4076, %v2468_v34   ;;  %v2486_v37 = vcombine.low %v2301_v43, %v2308_v9  ;;  %v2536_v41 = vcombine.low %v2528_v47, %v2535_v4 }
 0x19b   :  { %v2119_v5 = vrot.slane %v2105_v45, %v5584_v40  ;;  %v2487_v62 = vcombine.low %v2315_v12, %v2322_v25  ;;  %v2537_v13 = vcombine.low %v2385_v60, %v2392_v2  ;;  %v2538_v48 = vcombine.low %v2399_v39, %v2406_v8 }
 0x19c   :  { %v2899_v38 = vcombine.low %v2891_v32, %v2898_v7  ;;  %v2805_v43 = vrot.slane %v1733_v56, %v5550_v0  ;;  %v2812_v59 = vrot.slane %v1733_v56, %v5553_v49  ;;  %v2819_v44 = vrot.slane %v1733_v56, %v5556_v30 }
 0x19d   :  { %v1654_v58 = vpop.xlane.xlu0 %1653  ;;  %v2494_v18 = vrot.slane %v2486_v37, %v5584_v40  ;;  %v2826_v57 = vrot.slane %v1733_v56, %v5559_v35  ;;  %v2501_v31 = vrot.slane %v2487_v62, %v5584_v40  ;;  %v2545_v3 = vrot.slane %v2537_v13, %v5584_v40 }
 0x19e   :  { %v1732_v61 = vmul.f32 0.00390625, %v1654_v58  ;;  %3020 = vperm.xlu0 %4075, %v2899_v38   ;;  %2584 = vperm.xlu1 %4076, %v2519_v63   ;;  %v2552_v28 = vrot.slane %v2538_v48, %v5584_v40  ;;  %v2900_v12 = vcombine.low %v2693_v46, %v2700_v14  ;;  %v2901_v54 = vcombine.low %v2707_v11, %v2714_v36 }
 0x19f   :  { %v2120_v32 = vcombine.low %v2112_v29, %v2119_v5  ;;  %v2968_v7 = vcombine.low %v2805_v43, %v2812_v59  ;;  %v2502_v2 = vcombine.low %v2494_v18, %v2501_v31  ;;  %v2969_v53 = vcombine.low %v2819_v44, %v2826_v57 }
 0x1a0   :  { %v2777_v27 = vrot.slane %v1732_v61, %v5550_v0  ;;  %v2784_v50 = vrot.slane %v1732_v61, %v5553_v49  ;;  %v2791_v19 = vrot.slane %v1732_v61, %v5556_v30  ;;  %v2798_v21 = vrot.slane %v1732_v61, %v5559_v35 }
 0x1a1   :  { %v1648_v22 = vpop.xlane.xlu1 %1647  ;;  %v2908_v55 = vrot.slane %v2900_v12, %v5584_v40  ;;  %v2915_v33 = vrot.slane %v2901_v54, %v5584_v40  ;;  %v2553_v8 = vcombine.low %v2545_v3, %v2552_v28  ;;  %v2976_v63 = vrot.slane %v2968_v7, %v5584_v40 }
 0x1a2   :  { %v1730_v42 = vmul.f32 0.00390625, %v1648_v22  ;;  %v2951_v1 = vcombine.low %v2777_v27, %v2784_v50  ;;  %v2952_v51 = vcombine.low %v2791_v19, %v2798_v21  ;;  %2587 = vperm.xlu1 %4076, %v2536_v41   ;;  %v2983_v29 = vrot.slane %v2969_v53, %v5584_v40 }
 0x1a3   :  { %v2916_v56 = vcombine.low %v2908_v55, %v2915_v33 }
 0x1a4   :  { %v2721_v23 = vrot.slane %v1730_v42, %v5550_v0  ;;  %v2728_v17 = vrot.slane %v1730_v42, %v5553_v49  ;;  %v2735_v20 = vrot.slane %v1730_v42, %v5556_v30  ;;  %v2742_v9 = vrot.slane %v1730_v42, %v5559_v35 }
 0x1a5   :  { %v2959_v52 = vrot.slane %v2951_v1, %v5584_v40  ;;  %v2966_v26 = vrot.slane %v2952_v51, %v5584_v40  ;;  %v2984_v43 = vcombine.low %v2976_v63, %v2983_v29 }
 0x1a6   :  { %v1639_v6 = vpop.xlane.xlu0 %1638  ;;  %v2917_v60 = vcombine.low %v2721_v23, %v2728_v17  ;;  %v2918_v25 = vcombine.low %v2735_v20, %v2742_v9  ;;  %2143 = vperm.xlu1 %4076, %v2120_v32  }
 0x1a7   :  { %v1727_v24 = vmul.f32 0.00390625, %v1639_v6  ;;  %v2967_v16 = vcombine.low %v2959_v52, %v2966_v26 }
 0x1a8   :  { %v2925_v34 = vrot.slane %v2917_v60, %v5584_v40  ;;  %v2932_v38 = vrot.slane %v2918_v25, %v5584_v40 }
 0x1a9   :  { %3032 = vperm.xlu0 %4075, %v2967_v16   ;;  %v2413_v39 = vrot.slane %v1727_v24, %v5550_v0  ;;  %v2420_v58 = vrot.slane %v1727_v24, %v5553_v49  ;;  %v2427_v47 = vrot.slane %v1727_v24, %v5556_v30  ;;  %v2434_v4 = vrot.slane %v1727_v24, %v5559_v35 }
 0x1aa   :  { %2590 = vperm.xlu1 %4076, %v2553_v8   ;;  %v2933_v61 = vcombine.low %v2925_v34, %v2932_v38 }
 0x1ab   :  { %v1666_v15 = vpop.xlane.xlu1 %1665  ;;  %v2554_v19 = vcombine.low %v2413_v39, %v2420_v58  ;;  %v2555_v21 = vcombine.low %v2427_v47, %v2434_v4 }
 0x1ac   :  { %v1736_v46 = vmul.f32 0.00390625, %v1666_v15 }
 0x1ad   :  { %2581 = vperm.xlu0 %4075, %v2502_v2   ;;  %v2562_v59 = vrot.slane %v2554_v19, %v5584_v40  ;;  %v2569_v44 = vrot.slane %v2555_v21, %v5584_v40 }
 0x1ae   :  { %v3113_v45 = vrot.slane %v1736_v46, %v5550_v0  ;;  %v3120_v14 = vrot.slane %v1736_v46, %v5553_v49  ;;  %v3127_v11 = vrot.slane %v1736_v46, %v5556_v30  ;;  %v3134_v36 = vrot.slane %v1736_v46, %v5559_v35  ;;  %3023 = vperm.xlu1 %4076, %v2916_v56  }
 0x1af   :  { %v2570_v26 = vcombine.low %v2562_v59, %v2569_v44 }
 0x1b0   :  { %v1660_v37 = vpop.xlane.xlu0 %1659  ;;  %v3331_v27 = vcombine.low %v3113_v45, %v3120_v14  ;;  %v3332_v50 = vcombine.low %v3127_v11, %v3134_v36 }
 0x1b1   :  { %v1734_v22 = vmul.f32 0.00390625, %v1660_v37  ;;  %3026 = vperm.xlu0 %4075, %v2933_v61  }
 0x1b2   :  { %v3339_v41 = vrot.slane %v3331_v27, %v5584_v40  ;;  %v3346_v5 = vrot.slane %v3332_v50, %v5584_v40  ;;  %3035 = vperm.xlu1 %4076, %v2984_v43  }
 0x1b3   :  { %v2833_v62 = vrot.slane %v1734_v22, %v5550_v0  ;;  %v2840_v13 = vrot.slane %v1734_v22, %v5553_v49  ;;  %v2847_v42 = vrot.slane %v1734_v22, %v5556_v30  ;;  %v2854_v1 = vrot.slane %v1734_v22, %v5559_v35 }
 0x1b4   :  { %v1678_v51 = vpop.xlane.xlu1 %1677  ;;  %v3347_v48 = vcombine.low %v3339_v41, %v3346_v5 }
 0x1b5   :  { %v1740_v18 = vmul.f32 0.00390625, %v1678_v51  ;;  %v2985_v23 = vcombine.low %v2833_v62, %v2840_v13  ;;  %v2986_v17 = vcombine.low %v2847_v42, %v2854_v1 }
 0x1b6   :  { %3468 = vperm.xlu0 %4075, %v3347_v48   ;;  %2593 = vperm.xlu1 %4076, %v2570_v26  }
 0x1b7   :  { %v3225_v20 = vrot.slane %v1740_v18, %v5550_v0  ;;  %v3232_v9 = vrot.slane %v1740_v18, %v5553_v49  ;;  %v3239_v57 = vrot.slane %v1740_v18, %v5556_v30  ;;  %v3246_v52 = vrot.slane %v1740_v18, %v5559_v35 }
 0x1b8   :  { %v2993_v31 = vrot.slane %v2985_v23, %v5584_v40  ;;  %v3000_v6 = vrot.slane %v2986_v17, %v5584_v40 }
 0x1b9   :  { %v1669_v3 = vpop.xlane.xlu0 %1668  ;;  %v3399_v28 = vcombine.low %v3225_v20, %v3232_v9  ;;  %v3400_v12 = vcombine.low %v3239_v57, %v3246_v52 }
 0x1ba   :  { %v1737_v54 = vmul.f32 0.00390625, %v1669_v3  ;;  %v3001_v60 = vcombine.low %v2993_v31, %v3000_v6 }
 0x1bb   :  { %v3407_v24 = vrot.slane %v3399_v28, %v5584_v40  ;;  %v3414_v16 = vrot.slane %v3400_v12, %v5584_v40 }
 0x1bc   :  { %v3141_v25 = vrot.slane %v1737_v54, %v5550_v0  ;;  %v3148_v32 = vrot.slane %v1737_v54, %v5553_v49  ;;  %v3155_v7 = vrot.slane %v1737_v54, %v5556_v30  ;;  %v3162_v2 = vrot.slane %v1737_v54, %v5559_v35  ;;  %3038 = vperm.xlu1 %4076, %v3001_v60  }
 0x1bd   :  { %v3415_v55 = vcombine.low %v3407_v24, %v3414_v16 }
 0x1be   :  { %v3348_v33 = vcombine.low %v3141_v25, %v3148_v32  ;;  %v3349_v53 = vcombine.low %v3155_v7, %v3162_v2 }
 0x1bf   :  { %3480 = vperm.xlu0 %4075, %v3415_v55  }
 0x1c0   :  { %v3356_v8 = vrot.slane %v3348_v33, %v5584_v40  ;;  %v3363_v34 = vrot.slane %v3349_v53, %v5584_v40 }
 0x1c1   :  { %v1690_v15 = vpop.xlane.xlu1 %1689 }
 0x1c2   :  { %v1744_v39 = vmul.f32 0.00390625, %v1690_v15  ;;  %v3364_v4 = vcombine.low %v3356_v8, %v3363_v34 }
 0x1c4   :  { %v3561_v38 = vrot.slane %v1744_v39, %v5550_v0  ;;  %v3568_v46 = vrot.slane %v1744_v39, %v5553_v49  ;;  %v3575_v58 = vrot.slane %v1744_v39, %v5556_v30  ;;  %v3582_v47 = vrot.slane %v1744_v39, %v5559_v35  ;;  %v1681_v45 = vpop.xlane.xlu0 %1680  ;;  %3471 = vperm.xlu1 %4076, %v3364_v4  }
 0x1c5   :  { %v1741_v36 = vmul.f32 0.00390625, %v1681_v45 }
 0x1c6   :  { %v3779_v14 = vcombine.low %v3561_v38, %v3568_v46  ;;  %v3780_v11 = vcombine.low %v3575_v58, %v3582_v47 }
 0x1c7   :  { %v3253_v63 = vrot.slane %v1741_v36, %v5550_v0  ;;  %v3260_v29 = vrot.slane %v1741_v36, %v5553_v49  ;;  %v3267_v37 = vrot.slane %v1741_v36, %v5556_v30  ;;  %v3274_v27 = vrot.slane %v1741_v36, %v5559_v35 }
 0x1c8   :  { %v3787_v61 = vrot.slane %v3779_v14, %v5584_v40  ;;  %v3794_v56 = vrot.slane %v3780_v11, %v5584_v40 }
 0x1c9   :  { %v3416_v19 = vcombine.low %v3253_v63, %v3260_v29  ;;  %v3417_v21 = vcombine.low %v3267_v37, %v3274_v27 }
 0x1ca   :  { %v3795_v50 = vcombine.low %v3787_v61, %v3794_v56 }
 0x1cb   :  { %v3424_v41 = vrot.slane %v3416_v19, %v5584_v40  ;;  %v3431_v5 = vrot.slane %v3417_v21, %v5584_v40 }
 0x1cc   :  { %3916 = vperm.xlu0 %4075, %v3795_v50   ;;  %v1702_v22 = vpop.xlane.xlu1 %1701 }
 0x1cd   :  { %v1748_v62 = vmul.f32 0.00390625, %v1702_v22  ;;  %v3432_v13 = vcombine.low %v3424_v41, %v3431_v5 }
 0x1cf   :  { %v3673_v42 = vrot.slane %v1748_v62, %v5550_v0  ;;  %v3680_v1 = vrot.slane %v1748_v62, %v5553_v49  ;;  %v3687_v51 = vrot.slane %v1748_v62, %v5556_v30  ;;  %v3694_v48 = vrot.slane %v1748_v62, %v5559_v35  ;;  %v1693_v43 = vpop.xlane.xlu0 %1692  ;;  %3483 = vperm.xlu1 %4076, %v3432_v13  }
 0x1d0   :  { %v1745_v59 = vmul.f32 0.00390625, %v1693_v43 }
 0x1d1   :  { %v3847_v44 = vcombine.low %v3673_v42, %v3680_v1  ;;  %v3848_v18 = vcombine.low %v3687_v51, %v3694_v48 }
 0x1d2   :  { %v3589_v23 = vrot.slane %v1745_v59, %v5550_v0  ;;  %v3596_v17 = vrot.slane %v1745_v59, %v5553_v49  ;;  %v3603_v20 = vrot.slane %v1745_v59, %v5556_v30  ;;  %v3610_v9 = vrot.slane %v1745_v59, %v5559_v35 }
 0x1d3   :  { %v3855_v52 = vrot.slane %v3847_v44, %v5584_v40  ;;  %v3862_v26 = vrot.slane %v3848_v18, %v5584_v40 }
 0x1d4   :  { %v1651_v57 = vpop.xlane.xlu1 %1650  ;;  %v3796_v6 = vcombine.low %v3589_v23, %v3596_v17  ;;  %v3797_v3 = vcombine.low %v3603_v20, %v3610_v9 }
 0x1d5   :  { %v1731_v31 = vmul.f32 0.00390625, %v1651_v57  ;;  %v3863_v28 = vcombine.low %v3855_v52, %v3862_v26 }
 0x1d6   :  { %v3804_v60 = vrot.slane %v3796_v6, %v5584_v40  ;;  %v3811_v25 = vrot.slane %v3797_v3, %v5584_v40 }
 0x1d7   :  { %v2749_v12 = vrot.slane %v1731_v31, %v5550_v0  ;;  %v2756_v54 = vrot.slane %v1731_v31, %v5553_v49  ;;  %v2763_v24 = vrot.slane %v1731_v31, %v5556_v30  ;;  %v2770_v16 = vrot.slane %v1731_v31, %v5559_v35  ;;  %3928 = vperm.xlu0 %4075, %v3863_v28  }
 0x1d8   :  { %v3812_v33 = vcombine.low %v3804_v60, %v3811_v25 }
 0x1d9   :  { %v1705_v32 = vpop.xlane.xlu0 %1704  ;;  %v2934_v7 = vcombine.low %v2749_v12, %v2756_v54  ;;  %v2935_v2 = vcombine.low %v2763_v24, %v2770_v16 }
 0x1da   :  { %v1749_v55 = vmul.f32 0.00390625, %v1705_v32  ;;  %3919 = vperm.xlu1 %4076, %v3812_v33  }
 0x1db   :  { %v2942_v53 = vrot.slane %v2934_v7, %v5584_v40  ;;  %v2949_v15 = vrot.slane %v2935_v2, %v5584_v40 }
 0x1dc   :  { %v3701_v39 = vrot.slane %v1749_v55, %v5550_v0  ;;  %v3708_v8 = vrot.slane %v1749_v55, %v5553_v49  ;;  %v3715_v34 = vrot.slane %v1749_v55, %v5556_v30  ;;  %v3722_v38 = vrot.slane %v1749_v55, %v5559_v35 }
 0x1dd   :  { %v2950_v46 = vcombine.low %v2942_v53, %v2949_v15 }
 0x1de   :  { %v1672_v58 = vpop.xlane.xlu1 %1671  ;;  %v3864_v47 = vcombine.low %v3701_v39, %v3708_v8  ;;  %v3865_v4 = vcombine.low %v3715_v34, %v3722_v38 }
 0x1df   :  { %v1738_v45 = vmul.f32 0.00390625, %v1672_v58  ;;  %3029 = vperm.xlu0 %4075, %v2950_v46  }
 0x1e0   :  { %v3872_v14 = vrot.slane %v3864_v47, %v5584_v40  ;;  %v3879_v11 = vrot.slane %v3865_v4, %v5584_v40 }
 0x1e1   :  { %v3169_v36 = vrot.slane %v1738_v45, %v5550_v0  ;;  %v3176_v61 = vrot.slane %v1738_v45, %v5553_v49  ;;  %v3183_v56 = vrot.slane %v1738_v45, %v5556_v30  ;;  %v3190_v63 = vrot.slane %v1738_v45, %v5559_v35 }
 0x1e2   :  { %v3880_v29 = vcombine.low %v3872_v14, %v3879_v11  ;;  %v1663_v37 = vpop.xlane.xlu0 %1662 }
 0x1e3   :  { %v3365_v27 = vcombine.low %v3169_v36, %v3176_v61  ;;  %v3366_v50 = vcombine.low %v3183_v56, %v3190_v63  ;;  %v1735_v19 = vmul.f32 0.00390625, %v1663_v37 }
 0x1e4   :  { %3931 = vperm.xlu1 %4076, %v3880_v29  }
 0x1e5   :  { %v3373_v21 = vrot.slane %v3365_v27, %v5584_v40  ;;  %v3380_v22 = vrot.slane %v3366_v50, %v5584_v40  ;;  %v2861_v41 = vrot.slane %v1735_v19, %v5550_v0  ;;  %v2868_v5 = vrot.slane %v1735_v19, %v5553_v49 }
 0x1e6   :  { %v2875_v62 = vrot.slane %v1735_v19, %v5556_v30  ;;  %v2882_v13 = vrot.slane %v1735_v19, %v5559_v35 }
 0x1e7   :  { %v1696_v42 = vpop.xlane.xlu1 %1695  ;;  %v3381_v1 = vcombine.low %v3373_v21, %v3380_v22  ;;  %v3002_v48 = vcombine.low %v2861_v41, %v2868_v5 }
 0x1e8   :  { %v1746_v51 = vmul.f32 0.00390625, %v1696_v42  ;;  %v3003_v43 = vcombine.low %v2875_v62, %v2882_v13 }
 0x1e9   :  { %3474 = vperm.xlu0 %4075, %v3381_v1   ;;  %v3010_v17 = vrot.slane %v3002_v48, %v5584_v40 }
 0x1ea   :  { %v3617_v59 = vrot.slane %v1746_v51, %v5550_v0  ;;  %v3624_v44 = vrot.slane %v1746_v51, %v5553_v49  ;;  %v3631_v18 = vrot.slane %v1746_v51, %v5556_v30  ;;  %v3638_v23 = vrot.slane %v1746_v51, %v5559_v35 }
 0x1eb   :  { %v3017_v20 = vrot.slane %v3003_v43, %v5584_v40 }
 0x1ec   :  { %v1684_v9 = vpop.xlane.xlu0 %1683  ;;  %v3813_v57 = vcombine.low %v3617_v59, %v3624_v44  ;;  %v3814_v52 = vcombine.low %v3631_v18, %v3638_v23 }
 0x1ed   :  { %v1742_v26 = vmul.f32 0.00390625, %v1684_v9  ;;  %v3018_v31 = vcombine.low %v3010_v17, %v3017_v20 }
 0x1ee   :  { %v3821_v6 = vrot.slane %v3813_v57, %v5584_v40  ;;  %v3828_v3 = vrot.slane %v3814_v52, %v5584_v40 }
 0x1ef   :  { %v3281_v28 = vrot.slane %v1742_v26, %v5550_v0  ;;  %v3288_v12 = vrot.slane %v1742_v26, %v5553_v49  ;;  %v3295_v54 = vrot.slane %v1742_v26, %v5556_v30  ;;  %v3302_v24 = vrot.slane %v1742_v26, %v5559_v35  ;;  %3041 = vperm.xlu1 %4076, %v3018_v31  }
 0x1f0   :  { %v3829_v16 = vcombine.low %v3821_v6, %v3828_v3 }
 0x1f1   :  { %v1675_v60 = vpop.xlane.xlu1 %1674  ;;  %v3433_v25 = vcombine.low %v3281_v28, %v3288_v12  ;;  %v3434_v32 = vcombine.low %v3295_v54, %v3302_v24 }
 0x1f2   :  { %v1739_v7 = vmul.f32 0.00390625, %v1675_v60  ;;  %3922 = vperm.xlu0 %4075, %v3829_v16  }
 0x1f3   :  { %v3441_v2 = vrot.slane %v3433_v25, %v5584_v40  ;;  %v3448_v55 = vrot.slane %v3434_v32, %v5584_v40 }
 0x1f4   :  { %v3197_v33 = vrot.slane %v1739_v7, %v5550_v0  ;;  %v3204_v53 = vrot.slane %v1739_v7, %v5553_v49  ;;  %v3211_v15 = vrot.slane %v1739_v7, %v5556_v30  ;;  %v3218_v39 = vrot.slane %v1739_v7, %v5559_v35 }
 0x1f5   :  { %v3449_v8 = vcombine.low %v3441_v2, %v3448_v55  ;;  %v1708_v34 = vpop.xlane.xlu0 %1707 }
 0x1f6   :  { %v3382_v38 = vcombine.low %v3197_v33, %v3204_v53  ;;  %v3383_v46 = vcombine.low %v3211_v15, %v3218_v39  ;;  %v1750_v58 = vmul.f32 0.00390625, %v1708_v34  ;;  %v6354_v33 = vlaneseq }
 0x1f7   :  { %3486 = vperm.xlu1 %4076, %v3449_v8  }
 0x1f8   :  { %v3390_v47 = vrot.slane %v3382_v38, %v5584_v40  ;;  %v3397_v4 = vrot.slane %v3383_v46, %v5584_v40  ;;  %v3729_v45 = vrot.slane %v1750_v58, %v5550_v0  ;;  %v3736_v14 = vrot.slane %v1750_v58, %v5553_v49 }
 0x1f9   :  { %v3743_v11 = vrot.slane %v1750_v58, %v5556_v30  ;;  %v3750_v36 = vrot.slane %v1750_v58, %v5559_v35 }
 0x1fa   :  { %v1699_v61 = vpop.xlane.xlu1 %1698  ;;  %v3398_v56 = vcombine.low %v3390_v47, %v3397_v4  ;;  %v3881_v29 = vcombine.low %v3729_v45, %v3736_v14 }
 0x1fb   :  { %v1747_v63 = vmul.f32 0.00390625, %v1699_v61  ;;  %v3882_v37 = vcombine.low %v3743_v11, %v3750_v36 }
 0x1fc   :  { %3477 = vperm.xlu0 %4075, %v3398_v56   ;;  %v3889_v22 = vrot.slane %v3881_v29, %v5584_v40 }
 0x1fd   :  { %v3645_v27 = vrot.slane %v1747_v63, %v5550_v0  ;;  %v3652_v50 = vrot.slane %v1747_v63, %v5553_v49  ;;  %v3659_v19 = vrot.slane %v1747_v63, %v5556_v30  ;;  %v3666_v21 = vrot.slane %v1747_v63, %v5559_v35 }
 0x1fe   :  { %v3896_v41 = vrot.slane %v3882_v37, %v5584_v40 }
 0x1ff   :  { %v1687_v5 = vpop.xlane.xlu0 %1686  ;;  %v3830_v62 = vcombine.low %v3645_v27, %v3652_v50  ;;  %v3831_v13 = vcombine.low %v3659_v19, %v3666_v21 }
 0x200   :  { %v1743_v42 = vmul.f32 0.00390625, %v1687_v5  ;;  %v3897_v1 = vcombine.low %v3889_v22, %v3896_v41 }
 0x201   :  { %v3838_v51 = vrot.slane %v3830_v62, %v5584_v40  ;;  %v3845_v48 = vrot.slane %v3831_v13, %v5584_v40  ;;  %v2123_v52 = vpop.permute.xlu1 %2122 }
 0x202   :  { %v3309_v43 = vrot.slane %v1743_v42, %v5550_v0  ;;  %v3316_v59 = vrot.slane %v1743_v42, %v5553_v49  ;;  %v3323_v44 = vrot.slane %v1743_v42, %v5556_v30  ;;  %v3330_v18 = vrot.slane %v1743_v42, %v5559_v35  ;;  %3934 = vperm.xlu1 %4076, %v3897_v1  }
 0x203   :  { %v3846_v23 = vcombine.low %v3838_v51, %v3845_v48 }
 0x204   :  { %v3450_v17 = vcombine.low %v3309_v43, %v3316_v59  ;;  %v3451_v20 = vcombine.low %v3323_v44, %v3330_v18  ;;  %v1711_v9 = vpop.xlane.xlu0 %1710 }
 0x205   :  { %v1751_v57 = vmul.f32 0.00390625, %v1711_v9  ;;  %3925 = vperm.xlu0 %4075, %v3846_v23   ;;  %v2135_v60 = vpop.permute.xlu1 %2134 }
 0x206   :  { %v3458_v26 = vrot.slane %v3450_v17, %v5584_v40  ;;  %v3465_v31 = vrot.slane %v3451_v20, %v5584_v40 }
 0x207   :  { %v3757_v6 = vrot.slane %v1751_v57, %v5550_v0  ;;  %v3764_v3 = vrot.slane %v1751_v57, %v5553_v49  ;;  %v3771_v28 = vrot.slane %v1751_v57, %v5556_v30  ;;  %v3778_v12 = vrot.slane %v1751_v57, %v5559_v35 }
 0x208   :  { %v3466_v54 = vcombine.low %v3458_v26, %v3465_v31  ;;  %v4166_v0 = vmov 0.0   ;;  %v5844_v30 = vand.u32 127, %v6354_v33 }
 0x209   :  { %v3898_v24 = vcombine.low %v3757_v6, %v3764_v3  ;;  %v3899_v16 = vcombine.low %v3771_v28, %v3778_v12  ;;  %v2138_v2 = vpop.permute.xlu1 %2137  ;;  %1752 = vst [vmem:[#allocation8] sm:$0xf] %v4166_v0 }
 0x20a   :  { %3489 = vperm.xlu1 %4076, %v3466_v54   ;;  %v2151_v53 = vadd.s32 4294967288, %v5844_v30  ;;  %v2158_v39 = vadd.s32 4294967280, %v5844_v30  ;;  %v5850_v34 = vsub.s32 %v5844_v30, %v6353_v10  ;;  %v2165_v4 = vadd.s32 4294967272, %v5844_v30 }
 0x20b   :  { %v3906_v25 = vrot.slane %v3898_v24, %v5584_v40  ;;  %v3913_v32 = vrot.slane %v3899_v16, %v5584_v40  ;;  %v2600_v42 = vadd.s32 4294967256, %v5844_v30  ;;  %v2595_v43 = vadd.s32 4294967264, %v5844_v30 }
 0x20c   :  { %v2126_v15 = vpop.permute.xlu0 %2125  ;;  %v5853_v38 = vsub.s32 %v2151_v53, %v6353_v10  ;;  %v5856_v58 = vsub.s32 %v2158_v39, %v6353_v10  ;;  %v2150_v45 = vrot.slane %v2123_v52, %v5850_v34  ;;  %v5863_v56 = vsub.s32 %v2165_v4, %v6353_v10 }
 0x20d   :  { %v3914_v7 = vcombine.low %v3906_v25, %v3913_v32  ;;  %v2129_v55 = vpop.permute.xlu1 %2128  ;;  %v2175_v27 = vrot.slane %v2135_v60, %v5850_v34  ;;  %v2603_v18 = vsub.s32 %v2600_v42, %v6353_v10  ;;  %v2614_v23 = vadd.s32 4294967240, %v5844_v30 }
 0x20e   :  { %v2155_v14 = vrot.slane %v2126_v15, %v5853_v38  ;;  %v2162_v11 = vrot.slane %v2129_v55, %v5856_v58  ;;  %v2179_v63 = vrot.slane %v2138_v2, %v5853_v38  ;;  %v2607_v17 = vadd.s32 4294967248, %v5844_v30 }
 0x20f   :  { %3937 = vperm.xlu1 %4076, %v3914_v7   ;;  %v2598_v9 = vsub.s32 %v2595_v43, %v6353_v10  ;;  %v2617_v52 = vsub.s32 %v2614_v23, %v6353_v10 }
 0x210   :  { %v2132_v46 = vpop.permute.xlu0 %2131  ;;  %v2157_v37 = vsel %vm2156_vm0, %v2155_v14, %v2150_v45  ;;  %v2180_v41 = vsel %vm2156_vm0, %v2179_v63, %v2175_v27  ;;  %v2610_v26 = vsub.s32 %v2607_v17, %v6353_v10  ;;  %v3048_v45 = vadd.s32 4294967224, %v5844_v30 }
 0x211   :  { %v2141_v49 = vpop.permute.xlu1 %2140  ;;  %v2164_v50 = vsel %vm2163_vm1, %v2162_v11, %v2157_v37  ;;  %v2169_v22 = vrot.slane %v2132_v46, %v5863_v56  ;;  %v3043_v11 = vadd.s32 4294967232, %v5844_v30  ;;  %v3062_v63 = vadd.s32 4294967208, %v5844_v30 }
 0x212   :  { %v2184_v29 = vrot.slane %v2141_v49, %v5856_v58 }
 0x213   :  { %v2171_v13 = vsel %vm2170_vm2, %v2169_v22, %v2164_v50  ;;  %v3046_v37 = vsub.s32 %v3043_v11, %v6353_v10 }
 0x214   :  { %v2579_v36 = vpop.permute.xlu0 %2578  ;;  %v2185_v62 = vsel %vm2163_vm1, %v2184_v29, %v2180_v41  ;;  %v3055_v29 = vadd.s32 4294967216, %v5844_v30 }
 0x215   :  { %v2573_v35 = vpop.permute.xlu1 %2572  ;;  %v2611_v60 = vrot.slane %v2579_v36, %v2610_v26 }
 0x216   :  { %v2599_v3 = vrot.slane %v2573_v35, %v2598_v9  ;;  %v3058_v22 = vsub.s32 %v3055_v29, %v6353_v10 }
 0x219   :  { %v2576_v8 = vpop.permute.xlu1 %2575 }
 0x21a   :  { %v2604_v57 = vrot.slane %v2576_v8, %v2603_v18 }
 0x21c   :  { %v2606_v54 = vsel %vm2605_vm5, %v2604_v57, %v2599_v3  ;;  %v3491_v3 = vadd.s32 4294967200, %v5844_v30 }
 0x21d   :  { %v2585_v47 = vpop.permute.xlu1 %2584  ;;  %v5870_v19 = vpop.permute.xlu0 %3020  ;;  %v2613_v2 = vsel %vm2612_vm6, %v2611_v60, %v2606_v54 }
 0x21e   :  { %v2624_v24 = vrot.slane %v2585_v47, %v2598_v9 }
 0x221   :  { %v2588_v61 = vpop.permute.xlu1 %2587 }
 0x222   :  { %v2628_v28 = vrot.slane %v2588_v61, %v2603_v18  ;;  %v3051_v61 = vsub.s32 %v3048_v45, %v6353_v10 }
 0x224   :  { %v2629_v32 = vsel %vm2605_vm5, %v2628_v28, %v2624_v24  ;;  %v3510_v28 = vadd.s32 4294967176, %v5844_v30  ;;  %vm3545_vm5 = vcmask 1042176  }
 0x225   :  { %v2144_v21 = vpop.permute.xlu1 %2143 }
 0x226   :  { %v2189_v5 = vrot.slane %v2144_v21, %v5863_v56  ;;  %v3065_v21 = vsub.s32 %v3062_v63, %v6353_v10  ;;  %v3513_v60 = vsub.s32 %v3510_v28, %v6353_v10 }
 0x228   :  { %v2190_v1 = vsel %vm2170_vm2, %v2189_v5, %v2185_v62  ;;  %v5882_v44 = vpop.permute.xlu0 %3032  ;;  %v3047_v5 = vrot.slane %v5870_v19, %v3046_v37 }
 0x229   :  { %v2192_v51 = vsel %vm2191_vm3, %v2190_v1, %v2171_v13  ;;  %v2591_v48 = vpop.permute.xlu1 %2590  ;;  %v3072_v42 = vrot.slane %v5882_v44, %v3046_v37 }
 0x22a   :  { %v2199_v59 = vrot.slane %v2192_v51, %v5584_v40  ;;  %v2633_v12 = vrot.slane %v2591_v48, %v2610_v26  ;;  %v3496_v26 = vadd.s32 4294967192, %v5844_v30 }
 0x22c   :  { %2202 = vst.msk [vmem:[#allocation8] sm:$0x3] %vm2201_vm4, %v2199_v59  ;;  %v2582_v31 = vpop.permute.xlu0 %2581  ;;  %v2634_v55 = vsel %vm2612_vm6, %v2633_v12, %v2629_v32  ;;  %v3499_v12 = vsub.s32 %v3496_v26, %v6353_v10 }
 0x22d   :  { %v3024_v20 = vpop.permute.xlu1 %3023  ;;  %v2618_v16 = vrot.slane %v2582_v31, %v2617_v52 }
 0x22e   :  { %v3052_v50 = vrot.slane %v3024_v20, %v3051_v61 }
 0x22f   :  { %v2620_v0 = vsel %vm2619_vm7, %v2618_v16, %v2613_v2  ;;  %v3494_v16 = vsub.s32 %v3491_v3, %v6353_v10 }
 0x230   :  { %v3027_v53 = vpop.permute.xlu0 %3026  ;;  %v3054_v1 = vsel %vm3053_vm9, %v3052_v50, %v3047_v5 }
 0x231   :  { %v3036_v6 = vpop.permute.xlu1 %3035  ;;  %v3059_v48 = vrot.slane %v3027_v53, %v3058_v22 }
 0x232   :  { %v3076_v62 = vrot.slane %v3036_v6, %v3051_v61  ;;  %v3503_v6 = vadd.s32 4294967184, %v5844_v30 }
 0x233   :  { %v3061_v17 = vsel %vm3060_vm10, %v3059_v48, %v3054_v1 }
 0x234   :  { %v3077_v59 = vsel %vm3053_vm9, %v3076_v62, %v3072_v42  ;;  %v3506_v54 = vsub.s32 %v3503_v6, %v6353_v10  ;;  %v6355_v42 = vld [vmem:[#allocation13_spill] sm:$0xff] }
 0x235   :  { %v2594_v25 = vpop.permute.xlu1 %2593  ;;  %v5893_v39 = vpop.permute.xlu0 %3468 }
 0x236   :  { %v2638_v7 = vrot.slane %v2594_v25, %v2617_v52 }
 0x238   :  { %v2639_v49 = vsel %vm2619_vm7, %v2638_v7, %v2634_v55 }
 0x239   :  { %v2640_v33 = vsel %vm2191_vm3, %v2639_v49, %v2620_v0  ;;  %v3495_v0 = vrot.slane %v5893_v39, %v3494_v16 }
 0x23a   :  { %v2647_v35 = vrot.slane %v2640_v33, %v5584_v40 }
 0x23b   :  { %v3039_v15 = vpop.permute.xlu1 %3038 }
 0x23c   :  { %2650 = vst.msk [vmem:[#allocation8] sm:$0x3] %vm2649_vm8, %v2647_v35  ;;  %v3081_v13 = vrot.slane %v3039_v15, %v3058_v22 }
 0x23e   :  { %v5897_v46 = vpop.permute.xlu0 %3480  ;;  %v3082_v23 = vsel %vm3060_vm10, %v3081_v13, %v3077_v59 }
 0x23f   :  { %v3520_v30 = vrot.slane %v5897_v46, %v3494_v16 }
 0x243   :  { %v5895_v8 = vpop.permute.xlu1 %3471 }
 0x244   :  { %v3500_v32 = vrot.slane %v5895_v8, %v3499_v12 }
 0x246   :  { %v3502_v10 = vsel %vm3501_vm13, %v3500_v32, %v3495_v0 }
 0x24b   :  { %v5901_v4 = vpop.permute.xlu0 %3916 }
 0x24e   :  { %v5899_v47 = vpop.permute.xlu1 %3483 }
 0x24f   :  { %v3524_v7 = vrot.slane %v5899_v47, %v3499_v12  ;;  %v3942_v47 = vrot.slane %v5901_v4, %v5850_v34 }
 0x251   :  { %v3525_v53 = vsel %vm3501_vm13, %v3524_v7, %v3520_v30 }
 0x256   :  { %v5907_v36 = vpop.permute.xlu0 %3928 }
 0x257   :  { %v3961_v29 = vrot.slane %v5907_v36, %v5850_v34  ;;  %v3990_v34 = vld [vmem:[#allocation6 + $0x40] ss:$8 sm:$0x3] }
 0x258   :  { %v3995_v1 = vrot.slane %v3990_v34, %v6355_v42 }
 0x259   :  { %v5904_v14 = vpop.permute.xlu1 %3919 }
 0x25a   :  { %v3946_v33 = vrot.slane %v5904_v14, %v5853_v38 }
 0x25c   :  { %v3947_v37 = vsel %vm2156_vm0, %v3946_v33, %v3942_v47 }
 0x25e   :  { %v3030_v41 = vpop.permute.xlu0 %3029 }
 0x25f   :  { %v3066_v51 = vrot.slane %v3030_v41, %v3065_v21 }
 0x261   :  { %v3068_v20 = vsel %vm3067_vm11, %v3066_v51, %v3061_v17  ;;  %v6356_v51 = vld [vmem:[#allocation14_spill] sm:$0xff] }
 0x262   :  { %v3999_v48 = vrot.slane %v3990_v34, %v6356_v51 }
 0x263   :  { %v5913_v27 = vpop.permute.xlu1 %3931 }
 0x264   :  { %v3965_v39 = vrot.slane %v5913_v27, %v5853_v38 }
 0x266   :  { %v3966_v38 = vsel %vm2156_vm0, %v3965_v39, %v3961_v29  ;;  %vm4021_vm0 = vcmask 1041408  }
 0x268   :  { %v3475_v52 = vpop.permute.xlu0 %3474 }
 0x269   :  { %v3507_v2 = vrot.slane %v3475_v52, %v3506_v54  ;;  %v4028_v52 = vstv %s5979_s2 }
 0x26b   :  { %v3509_v45 = vsel %vm3508_vm14, %v3507_v2, %v3502_v10 }
 0x26e   :  { %v3042_v43 = vpop.permute.xlu1 %3041 }
 0x26f   :  { %v3086_v18 = vrot.slane %v3042_v43, %v3065_v21 }
 0x271   :  { %v3087_v9 = vsel %vm3067_vm11, %v3086_v18, %v3082_v23  ;;  %v3923_v31 = vpop.permute.xlu0 %3922 }
 0x272   :  { %v3088_v57 = vsel %vm2191_vm3, %v3087_v9, %v3068_v20  ;;  %v3951_v11 = vrot.slane %v3923_v31, %v5856_v58 }
 0x273   :  { %v3095_v19 = vrot.slane %v3088_v57, %v5584_v40 }
 0x274   :  { %v3952_v41 = vsel %vm2163_vm1, %v3951_v11, %v3947_v37 }
 0x275   :  { %3098 = vst.msk [vmem:[#allocation8] sm:$0x3] %vm3097_vm12, %v3095_v19 }
 0x276   :  { %v3487_v44 = vpop.permute.xlu1 %3486 }
 0x277   :  { %v3529_v55 = vrot.slane %v3487_v44, %v3506_v54 }
 0x279   :  { %v3530_v46 = vsel %vm3508_vm14, %v3529_v55, %v3525_v53 }
 0x27b   :  { %v3478_v25 = vpop.permute.xlu0 %3477 }
 0x27c   :  { %v3514_v49 = vrot.slane %v3478_v25, %v3513_v60 }
 0x27e   :  { %v3516_v61 = vsel %vm3515_vm15, %v3514_v49, %v3509_v45 }
 0x281   :  { %v3935_v24 = vpop.permute.xlu1 %3934 }
 0x282   :  { %v3970_v14 = vrot.slane %v3935_v24, %v5856_v58 }
 0x284   :  { %v3926_v15 = vpop.permute.xlu0 %3925  ;;  %v3971_v58 = vsel %vm2163_vm1, %v3970_v14, %v3966_v38  ;;  %vm4030_vm1 = vcmask 263424  }
 0x285   :  { %v3956_v50 = vrot.slane %v3926_v15, %v5863_v56 }
 0x287   :  { %v3957_v36 = vsel %vm2170_vm2, %v3956_v50, %v3952_v41 }
 0x289   :  { %v3490_v35 = vpop.permute.xlu1 %3489 }
 0x28a   :  { %v3534_v8 = vrot.slane %v3490_v35, %v3513_v60 }
 0x28c   :  { %v3535_v63 = vsel %vm3515_vm15, %v3534_v8, %v3530_v46 }
 0x28d   :  { %v3536_v4 = vsel %vm2191_vm3, %v3535_v63, %v3516_v61 }
 0x28e   :  { %v3543_v21 = vrot.slane %v3536_v4, %v5584_v40  ;;  %v3938_v22 = vpop.permute.xlu1 %3937 }
 0x28f   :  { %v3975_v27 = vrot.slane %v3938_v22, %v5863_v56  ;;  %v4000_v56 = vcombine.low %v3995_v1, %v3999_v48 }
 0x290   :  { %3546 = vst.msk [vmem:[#allocation8] sm:$0x3] %vm3545_vm5, %v3543_v21 }
 0x291   :  { %v3976_v5 = vsel %vm2170_vm2, %v3975_v27, %v3971_v58  ;;  %v4007_v43 = vrot.slane %v4000_v56, %v5584_v40 }
 0x292   :  { %v3977_v62 = vsel %vm2191_vm3, %v3976_v5, %v3957_v36 }
 0x293   :  { %v3984_v13 = vrot.slane %v3977_v62, %v5584_v40 }
 0x295   :  { %3986 = vst.msk [vmem:[#allocation8 + $0x2] sm:$0x3] %vm2201_vm4, %v3984_v13 }
 0x29c   :  { %v3987_v59 = vld [vmem:[#allocation8] sm:$0xf] }
 0x29d   :  { %v3988_v18 = vmax.f32 %v3987_v59, 0.0 }
 0x29f   :  { %v4009_v23 = vmul.f32 %v4007_v43, %v3988_v18 }
 0x2a1   :  { %v4017_v17 = vrot.slane %v4009_v23, %v5584_v40 }
 0x2a3   :  { %v4018_v20 = vcombine.high %v4017_v17, %v4017_v17  ;;  %v4022_v9 = vsel %vm4021_vm0, %v4017_v17, 0.0 }
 0x2a5   :  { %v4023_v57 = vsel %vm2201_vm4, %v4018_v20, 0.0 }
 0x2a6   :  { %v4024_v19 = vadd.f32 %v4023_v57, %v4022_v9 }
 0x2a8   :  { %4025 = vadd.xlane.f32.xlu0 %v4024_v19 }
 0x335   :  { %v4026_v44 = vpop.xlane.xlu0 %4025 }
 0x336   :  { %v4029_v26 = vadd.f32 %v4028_v52, %v4026_v44 }
 0x338   :  { %4031 = vst.msk [vmem:[#allocation8 + $0x2] sm:$0x3] %vm4030_vm1, %v4029_v26 }
 0x339   :  { %4133 = shalt.err (!%p4130_p6)
}
 0x33a   :  { %s4134_s18 = scalar_lea.hbm %s5980_s3, 64 }
 0x33b   :  { %p4135_p7 = scmp.ne.s32.totalorder %s5980_s3, %s4134_s18  ;;  %p4138_p8 = scmp.lt.u32.totalorder %s4134_s18, %s5980_s3 }
 0x33d   :  { %p4140_p9 = pnand %p4138_p8, %p4135_p7 }
 0x33f   :  { %4143 = shalt.err (!%p4140_p9)
}
 0x340   :  { %4041 = dma.vmem_to_hbm [thread:$0]  %s4039_s14, 64, %s5980_s3, [#allocation5]  }
 0x341   :  { %4148 = dma.done.wait [#allocation5], 64  }
 0x342   :  { %4149 = vsyncadd [#allocation5], 4294967232 }
 0x343   :  { %4045 = vsyncpa [#allocation4], 1 }
 0x344   :  { %4046 = vsyncpa [#allocation7], 1 }
 0x345   :  { %4047 = vsyncpa [#allocation5], 1 }

</bundles_post_ra>
